<compile_context>
chip_gen: v5e
topology: v5e:2x2
jax: 0.10.0
libtpu: 0.0.40
codegen_flags: <defaults>
</compile_context>

<pallas_src>
import jax
import jax.numpy as jnp
from jax.experimental import pallas as pl
from jax.experimental.pallas import tpu as pltpu

LANE = 128


def _round_up(n, m):
    return ((n + m - 1) // m) * m


def mlp_kernel(x_ref, w1_ref, b1_ref, w2_ref, b2_ref, w3_ref, b3_ref, o_ref):
    # Layer 1: relu(x @ W1 + b1).
    # x arrives f32 straight from HBM; cast to the weight dtype (bf16) in-kernel
    # so the MXU runs bf16 x bf16 with f32 accumulation.  Compute is fully hidden
    # under the x-tile DMA, so this cast is free.
    x = x_ref[...].astype(w1_ref.dtype)
    h = jnp.dot(x, w1_ref[...], preferred_element_type=jnp.float32)
    h = jnp.maximum(h + b1_ref[...], 0.0)
    # Dropout(p=0.5) in eval mode == identity.
    # TODO(synk): training-mode dropout would use pltpu.prng_seed / prng_random_bits.

    # Layer 2: relu(h @ W2 + b2).  Tiny f32 weights, f32 accumulation.
    h = jnp.dot(h, w2_ref[...], preferred_element_type=jnp.float32)
    h = jnp.maximum(h + b2_ref[...], 0.0)
    # Dropout(eval) == identity.

    # Output layer: h @ W3 + b3 (W3/b3 columns zero-padded 9 -> 128 so padded
    # lanes stay exactly zero; store in bf16 to halve the output write).
    o = jnp.dot(h, w3_ref[...], preferred_element_type=jnp.float32)
    o_ref[...] = (o + b3_ref[...]).astype(o_ref.dtype)


def init_params(key, input_size=1000, dims=(64, 16, 16), n_classes=9, dtype=jnp.float32):
    # Mirrors the PyTorch module:
    #   layers: Linear(1000->64), Linear(64->16)   (only range(len(dims)-1) built)
    #   last:   Linear(16->9)
    full_dims = [input_size, *dims]
    layer_dims = [(full_dims[i], full_dims[i + 1]) for i in range(len(dims) - 1)]
    layer_dims.append((dims[-1], n_classes))
    params = {}
    for name, (din, dout) in zip(["1", "2", "3"], layer_dims):
        key, kw, kb = jax.random.split(key, 3)
        bound = 1.0 / jnp.sqrt(jnp.array(din, dtype))
        # Store weights in (in, out) layout so the kernel does x @ W directly.
        params[f"w{name}"] = jax.random.uniform(kw, (din, dout), dtype, -bound, bound)
        params[f"b{name}"] = jax.random.uniform(kb, (1, dout), dtype, -bound, bound)
    return params


def prepare_params(params, *, compute_dtype=jnp.bfloat16, out_dtype=jnp.bfloat16):
    """One-time (outside the hot path) weight prep:
       - W1 cast to bf16 (halves the biggest weight's HBM/VMEM; no K padding needed,
         x arrives with its natural K=1000).
       - W3 / b3: columns zero-padded n_classes -> 128 for lane-dense output stores.
       - W2 and biases stay f32 (tiny; bias-add / ReLU run in f32 on the VPU)."""
    w1, b1 = params["w1"], params["b1"]
    w2, b2 = params["w2"], params["b2"]
    w3, b3 = params["w3"], params["b3"]
    din, _ = w1.shape
    h2, c = w3.shape
    c_p = _round_up(c, LANE)

    w3p = jnp.zeros((h2, c_p), jnp.float32).at[:, :c].set(w3.astype(jnp.float32))
    b3p = jnp.zeros((1, c_p), jnp.float32).at[:, :c].set(b3.astype(jnp.float32))
    return dict(
        w1=w1.astype(compute_dtype),
        b1=b1.astype(jnp.float32),
        w2=w2.astype(jnp.float32), b2=b2.astype(jnp.float32),
        w3=w3p, b3=b3p,
        din=din, n_classes=c, out_dtype=out_dtype,
    )


def _device_info():
    """(vmem_bytes, num_tensorcores_sharing_the_grid) by device generation."""
    try:
        kind = jax.devices()[0].device_kind.lower()
    except Exception:
        kind = ""
    if "v7" in kind:
        return 64 << 20, 2        # v7x: 64 MiB VMEM per TC, 2 TCs share the grid
    if "v4" in kind or "v5p" in kind:
        return 128 << 20, 2       # megacore generations
    if "v5" in kind or "v6" in kind:
        return 128 << 20, 1       # v5e / v6e: single TC, 128 MiB VMEM
    return 64 << 20, 1            # unknown backend: be conservative


def _tile_vmem_bytes(bm, input_size, out_width):
    # Double-buffered f32 x tile + bf16 out tile (the Pallas pipeline), plus the
    # in-kernel bf16 copy of x and the (bm, 64) f32 hidden activation.
    return (2 * (bm * input_size * 4 + bm * out_width * 2)
            + bm * input_size * 2 + bm * 64 * 4)


def _choose_bm(batch, input_size, out_width, num_tc, vmem_bytes):
    budget = int(0.75 * vmem_bytes)
    cands = [c for c in (8192, 4096, 2048, 1024, 512, 256, 128)
             if _tile_vmem_bytes(c, input_size, out_width) <= budget]
    if not cands:
        return 128
    if num_tc >= 2 and batch > cands[-1]:
        # Prefer an even number of grid steps so the "parallel" batch axis splits
        # cleanly across the TensorCores (megacore sharding mainly hides the
        # per-step overhead; HBM is shared).
        for bm in cands:
            steps = pl.cdiv(batch, bm)
            if steps >= num_tc and steps % num_tc == 0:
                return bm
        for bm in cands:
            if pl.cdiv(batch, bm) >= num_tc:
                return bm
        return cands[-1]
    # Single TensorCore (v5e/v6e) or tiny batch: the grid is a serial loop, so one
    # big tile (full batch if it fits) beats multiple steps.
    bm_full = _round_up(max(batch, 8), 8)
    if _tile_vmem_bytes(bm_full, input_size, out_width) <= budget:
        return min(bm_full, cands[0])
    return cands[0]


def mlp_forward(x, prepped, *, bm=None):
    """x: (B, input_size) float32.  prepped: output of prepare_params."""
    B, din = x.shape
    assert din == prepped["din"]
    w1, b1 = prepped["w1"], prepped["b1"]
    w2, b2 = prepped["w2"], prepped["b2"]
    w3, b3 = prepped["w3"], prepped["b3"]
    h1 = w1.shape[1]
    h2, c_p = w3.shape
    n_classes = prepped["n_classes"]
    out_dtype = prepped["out_dtype"]

    vmem_bytes, num_tc = _device_info()
    if bm is None:
        bm = _choose_bm(B, din, c_p, num_tc, vmem_bytes)
    grid = (pl.cdiv(B, bm),)   # ragged last block handled by Pallas (masked writes)

    weight_bytes = sum(int(a.size) * a.dtype.itemsize for a in (w1, b1, w2, b2, w3, b3))
    tile_bytes = _tile_vmem_bytes(bm, din, c_p)
    vmem_limit = int(min(vmem_bytes, max(32 << 20, tile_bytes + weight_bytes + (4 << 20))))

    flops = 2 * B * (din * h1 + h1 * h2 + h2 * c_p)
    bytes_accessed = int(B * din * x.dtype.itemsize + weight_bytes + B * c_p * 2)

    out_padded = pl.pallas_call(
        mlp_kernel,
        out_shape=jax.ShapeDtypeStruct((B, c_p), out_dtype),
        grid=grid,
        in_specs=[
            pl.BlockSpec((bm, din), lambda i: (i, 0)),   # x tile, unpadded K (full dim)
            pl.BlockSpec((din, h1), lambda i: (0, 0)),   # W1 (bf16, resident across grid)
            pl.BlockSpec((1, h1), lambda i: (0, 0)),     # b1
            pl.BlockSpec((h1, h2), lambda i: (0, 0)),    # W2
            pl.BlockSpec((1, h2), lambda i: (0, 0)),     # b2
            pl.BlockSpec((h2, c_p), lambda i: (0, 0)),   # W3 (lane-padded)
            pl.BlockSpec((1, c_p), lambda i: (0, 0)),    # b3 (lane-padded)
        ],
        out_specs=pl.BlockSpec((bm, c_p), lambda i: (i, 0)),
        compiler_params=pltpu.CompilerParams(
            dimension_semantics=("parallel",),
            vmem_limit_bytes=vmem_limit,
        ),
        cost_estimate=pl.CostEstimate(
            flops=flops, transcendentals=0, bytes_accessed=bytes_accessed),
    )(x, w1, b1, w2, b2, w3, b3)

    # Slice off the lane padding and return f32 logits.
    return out_padded[:, :n_classes].astype(jnp.float32)


def reference_forward(x, params):
    h = jnp.maximum(x @ params["w1"] + params["b1"], 0.0)
    h = jnp.maximum(h @ params["w2"] + params["b2"], 0.0)
    return h @ params["w3"] + params["b3"]


if __name__ == "__main__":
    key = jax.random.PRNGKey(0)
    key, kx = jax.random.split(key)

    B = 256               # small demo batch; v7x -> bm=128 (2 even steps), v5e/v6e -> one 256-row tile
    INPUT_SIZE = 1000     # module default input_size
    DIMS = (64, 16, 16)
    N_CLASSES = 9

    params = init_params(key, input_size=INPUT_SIZE, dims=DIMS, n_classes=N_CLASSES)
    prepped = prepare_params(params)
    x = jax.random.normal(kx, (B, INPUT_SIZE), jnp.float32)

    out = mlp_forward(x, prepped)
    out = jax.block_until_ready(out)
    assert out.shape == (B, N_CLASSES)

    # Matched-precision reference (same bf16 rounding of x / W1, f32 math elsewhere).
    params_m = dict(params, w1=params["w1"].astype(jnp.bfloat16).astype(jnp.float32))
    ref_matched = reference_forward(x.astype(jnp.bfloat16).astype(jnp.float32), params_m)
    assert jnp.allclose(out, ref_matched, atol=2e-2, rtol=2e-2)

    # Full-f32 reference (looser tolerance: bf16 x/W1 over the K=1000 reduction + bf16 output).
    ref = reference_forward(x, params)
    assert jnp.allclose(out, ref, atol=5e-2, rtol=5e-2)

    print("KERNEL_OK")
</pallas_src>

<mosaic_0001>
module attributes {stable_mosaic.version = 11 : i64} {
  func.func @mlp_kernel(%arg0: i32, %arg1: memref<256x1000xf32, #tpu.memory_space<vmem>>, %arg2: memref<1000x64xbf16, #tpu.memory_space<vmem>>, %arg3: memref<1x64xf32, #tpu.memory_space<vmem>>, %arg4: memref<64x16xf32, #tpu.memory_space<vmem>>, %arg5: memref<1x16xf32, #tpu.memory_space<vmem>>, %arg6: memref<16x128xf32, #tpu.memory_space<vmem>>, %arg7: memref<1x128xf32, #tpu.memory_space<vmem>>, %arg8: memref<256x128xbf16, #tpu.memory_space<vmem>>) attributes {dimension_semantics = [#tpu.dimension_semantics<parallel>], iteration_bounds = array<i64: 1>, scalar_prefetch = 0 : i64, scratch_operands = 0 : i64, tpu.core_type = #tpu.core_type<tc>, window_params = [{transform_indices = @transform_0, window_bounds = array<i64: 256, 1000>}, {pipeline_mode = #tpu.pipeline_mode<synchronous>, transform_indices = @transform_1, window_bounds = array<i64: 1000, 64>}, {pipeline_mode = #tpu.pipeline_mode<synchronous>, transform_indices = @transform_2, window_bounds = array<i64: 1, 64>}, {pipeline_mode = #tpu.pipeline_mode<synchronous>, transform_indices = @transform_3, window_bounds = array<i64: 64, 16>}, {pipeline_mode = #tpu.pipeline_mode<synchronous>, transform_indices = @transform_4, window_bounds = array<i64: 1, 16>}, {pipeline_mode = #tpu.pipeline_mode<synchronous>, transform_indices = @transform_5, window_bounds = array<i64: 16, 128>}, {pipeline_mode = #tpu.pipeline_mode<synchronous>, transform_indices = @transform_6, window_bounds = array<i64: 1, 128>}, {transform_indices = @transform_7, window_bounds = array<i64: 256, 128>}]} {
    %c0 = arith.constant 0 : index
    %c0_0 = arith.constant 0 : index
    %0 = vector.load %arg1[%c0, %c0_0] : memref<256x1000xf32, #tpu.memory_space<vmem>>, vector<256x1000xf32>
    %1 = arith.truncf %0 : vector<256x1000xf32> to vector<256x1000xbf16>
    %c0_1 = arith.constant 0 : index
    %c0_2 = arith.constant 0 : index
    %2 = vector.load %arg2[%c0_1, %c0_2] : memref<1000x64xbf16, #tpu.memory_space<vmem>>, vector<1000x64xbf16>
    %cst = arith.constant dense<0.000000e+00> : vector<256x64xf32>
    %3 = tpu.matmul %1, %2, %cst {dimension_numbers = #tpu.dot_dimension_numbers<[1], [0], [0], [1], [0, 0, 1, 1], [], []>} : vector<256x1000xbf16>, vector<1000x64xbf16>, vector<256x64xf32> -> vector<256x64xf32>
    %c0_3 = arith.constant 0 : index
    %c0_4 = arith.constant 0 : index
    %4 = vector.load %arg3[%c0_3, %c0_4] : memref<1x64xf32, #tpu.memory_space<vmem>>, vector<1x64xf32>
    %5 = vector.broadcast %4 : vector<1x64xf32> to vector<256x64xf32>
    %6 = arith.addf %3, %5 : vector<256x64xf32>
    %cst_5 = arith.constant 0.000000e+00 : f32
    %7 = vector.broadcast %cst_5 : f32 to vector<256x64xf32>
    %8 = arith.maximumf %6, %7 : vector<256x64xf32>
    %c0_6 = arith.constant 0 : index
    %c0_7 = arith.constant 0 : index
    %9 = vector.load %arg4[%c0_6, %c0_7] : memref<64x16xf32, #tpu.memory_space<vmem>>, vector<64x16xf32>
    %cst_8 = arith.constant dense<0.000000e+00> : vector<256x16xf32>
    %10 = tpu.matmul %8, %9, %cst_8 {dimension_numbers = #tpu.dot_dimension_numbers<[1], [0], [0], [1], [0, 0, 1, 1], [], []>} : vector<256x64xf32>, vector<64x16xf32>, vector<256x16xf32> -> vector<256x16xf32>
    %c0_9 = arith.constant 0 : index
    %c0_10 = arith.constant 0 : index
    %11 = vector.load %arg5[%c0_9, %c0_10] : memref<1x16xf32, #tpu.memory_space<vmem>>, vector<1x16xf32>
    %12 = vector.broadcast %11 : vector<1x16xf32> to vector<256x16xf32>
    %13 = arith.addf %10, %12 : vector<256x16xf32>
    %cst_11 = arith.constant 0.000000e+00 : f32
    %14 = vector.broadcast %cst_11 : f32 to vector<256x16xf32>
    %15 = arith.maximumf %13, %14 : vector<256x16xf32>
    %c0_12 = arith.constant 0 : index
    %c0_13 = arith.constant 0 : index
    %16 = vector.load %arg6[%c0_12, %c0_13] : memref<16x128xf32, #tpu.memory_space<vmem>>, vector<16x128xf32>
    %cst_14 = arith.constant dense<0.000000e+00> : vector<256x128xf32>
    %17 = tpu.matmul %15, %16, %cst_14 {dimension_numbers = #tpu.dot_dimension_numbers<[1], [0], [0], [1], [0, 0, 1, 1], [], []>} : vector<256x16xf32>, vector<16x128xf32>, vector<256x128xf32> -> vector<256x128xf32>
    %c0_15 = arith.constant 0 : index
    %c0_16 = arith.constant 0 : index
    %18 = vector.load %arg7[%c0_15, %c0_16] : memref<1x128xf32, #tpu.memory_space<vmem>>, vector<1x128xf32>
    %19 = vector.broadcast %18 : vector<1x128xf32> to vector<256x128xf32>
    %20 = arith.addf %17, %19 : vector<256x128xf32>
    %21 = arith.truncf %20 : vector<256x128xf32> to vector<256x128xbf16>
    %c0_17 = arith.constant 0 : index
    %c0_18 = arith.constant 0 : index
    %22 = vector.load %arg8[%c0_17, %c0_18] : memref<256x128xbf16, #tpu.memory_space<vmem>>, vector<256x128xbf16>
    tpu.vector_store %arg8[%c0_17, %c0_18], %21 {strides = array<i32>} : memref<256x128xbf16, #tpu.memory_space<vmem>>, vector<256x128xbf16>,
    return
  }
  func.func @transform_0(%arg0: i32) -> (i32, i32) {
    %c0_i32 = arith.constant 0 : i32
    %c0_i32_0 = arith.constant 0 : i32
    return %arg0, %c0_i32 : i32, i32
  }
  func.func @transform_1(%arg0: i32) -> (i32, i32) {
    %c0_i32 = arith.constant 0 : i32
    %c0_i32_0 = arith.constant 0 : i32
    %c0_i32_1 = arith.constant 0 : i32
    return %c0_i32, %c0_i32_0 : i32, i32
  }
  func.func @transform_2(%arg0: i32) -> (i32, i32) {
    %c0_i32 = arith.constant 0 : i32
    %c0_i32_0 = arith.constant 0 : i32
    %c0_i32_1 = arith.constant 0 : i32
    return %c0_i32, %c0_i32_0 : i32, i32
  }
  func.func @transform_3(%arg0: i32) -> (i32, i32) {
    %c0_i32 = arith.constant 0 : i32
    %c0_i32_0 = arith.constant 0 : i32
    %c0_i32_1 = arith.constant 0 : i32
    return %c0_i32, %c0_i32_0 : i32, i32
  }
  func.func @transform_4(%arg0: i32) -> (i32, i32) {
    %c0_i32 = arith.constant 0 : i32
    %c0_i32_0 = arith.constant 0 : i32
    %c0_i32_1 = arith.constant 0 : i32
    return %c0_i32, %c0_i32_0 : i32, i32
  }
  func.func @transform_5(%arg0: i32) -> (i32, i32) {
    %c0_i32 = arith.constant 0 : i32
    %c0_i32_0 = arith.constant 0 : i32
    %c0_i32_1 = arith.constant 0 : i32
    return %c0_i32, %c0_i32_0 : i32, i32
  }
  func.func @transform_6(%arg0: i32) -> (i32, i32) {
    %c0_i32 = arith.constant 0 : i32
    %c0_i32_0 = arith.constant 0 : i32
    %c0_i32_1 = arith.constant 0 : i32
    return %c0_i32, %c0_i32_0 : i32, i32
  }
  func.func @transform_7(%arg0: i32) -> (i32, i32) {
    %c0_i32 = arith.constant 0 : i32
    %c0_i32_0 = arith.constant 0 : i32
    return %arg0, %c0_i32 : i32, i32
  }
}

</mosaic_0001>

<bundles_post_ra>
// kernel: tpu_custom_call.1
= control target key start
LH: loop header
LB: loop body
LE: loop exit
PB: predicated region body
PF: predicated region fallthrough
CT: control target
= control target key end

     0   :  { %s4307_s0 = inlined_call_operand.vmem [shape: f32[256,1000], index: 0, kind: input, shape index: {}]   ;;  %s4308_s1 = inlined_call_operand.vmem [shape: bf16[1000,64], index: 1, kind: input, shape index: {}]   ;;  %s4309_s2 = inlined_call_operand.vmem [shape: f32[1,64], index: 2, kind: input, shape index: {}]   ;;  %s4310_s3 = inlined_call_operand.vmem [shape: f32[64,16], index: 3, kind: input, shape index: {}]   ;;  %s4311_s4 = inlined_call_operand.vmem [shape: f32[1,16], index: 4, kind: input, shape index: {}]   ;;  %s4312_s5 = inlined_call_operand.vmem [shape: f32[16,128], index: 5, kind: input, shape index: {}]   ;;  %s4313_s6 = inlined_call_operand.vmem [shape: f32[1,128], index: 6, kind: input, shape index: {}]   ;;  %s4314_s7 = inlined_call_operand.hbm [shape: bf16[256,128], index: 7, kind: output, shape index: {}]  }
   0x1   :  { %v2600_v0 = vld [vmem:[%s4308_s1 + $0x38] sm:$0xff]  ;;  %v2599_v2 = vld [vmem:[%s4308_s1 + $0x30] sm:$0xff]  ;;  %v2598_v4 = vld [vmem:[%s4308_s1 + $0x28] sm:$0xff] }
   0x2   :  { %v2608_v1 = vld [vmem:[%s4308_s1 + $0x78] sm:$0xff]  ;;  %2750 = vmatpush.bf16.msra.mxu2 %v2600_v0  ;;  %v2607_v3 = vld [vmem:[%s4308_s1 + $0x70] sm:$0xff]  ;;  %969 = vmatpush.bf16.msra.mxu0 %v2600_v0  ;;  %v2606_v5 = vld [vmem:[%s4308_s1 + $0x68] sm:$0xff] }
   0x3   :  { %2758 = vmatpush.bf16.msra.mxu3 %v2608_v1  ;;  %1058 = vmatpush.bf16.msra.mxu1 %v2608_v1  ;;  %v2597_v6 = vld [vmem:[%s4308_s1 + $0x20] sm:$0xff] }
   0x4   :  { %v2605_v7 = vld [vmem:[%s4308_s1 + $0x60] sm:$0xff] }
   0x6   :  { %2751 = vmatpush.bf16.msra.mxu2 %v2599_v2  ;;  %970 = vmatpush.bf16.msra.mxu0 %v2599_v2 }
   0x7   :  { %2759 = vmatpush.bf16.msra.mxu3 %v2607_v3  ;;  %1059 = vmatpush.bf16.msra.mxu1 %v2607_v3 }
   0xa   :  { %2752 = vmatpush.bf16.msra.mxu2 %v2598_v4 }
   0xb   :  { %2760 = vmatpush.bf16.msra.mxu3 %v2606_v5 }
   0xc   :  { %12 = vsyncpa [#allocation3], 0  ;;  %971 = vmatpush.bf16.msra.mxu0 %v2598_v4  ;;  %1060 = vmatpush.bf16.msra.mxu1 %v2606_v5  ;;  %v2596_v8 = vld [vmem:[%s4308_s1 + $0x18] sm:$0xff]  ;;  %v2595_v10 = vld [vmem:[%s4308_s1 + $0x10] sm:$0xff]  ;;  %vm965_vm0 = vcmask 1043456   ;;  %vm916_vm1 = vcmask 850944  }
   0xd   :  { %v2604_v9 = vld [vmem:[%s4308_s1 + $0x58] sm:$0xff]  ;;  %v2603_v11 = vld [vmem:[%s4308_s1 + $0x50] sm:$0xff]  ;;  %v2594_v12 = vld [vmem:[%s4308_s1 + $0x8] sm:$0xff]  ;;  %vm1725_vm2 = vcmask 523264   ;;  %vm1973_vm3 = vcmask 130048   ;;  %s2253_s13 = sshll.u32 %s4314_s7, 4  ;;  %s2254_s13 = int_to_ptr.hbm [resolvable:$true] %s2253_s13 }
   0xe   :  { %2753 = vmatpush.bf16.msra.mxu2 %v2597_v6  ;;  %v2602_v13 = vld [vmem:[%s4308_s1 + $0x48] sm:$0xff]  ;;  %v2593_v14 = vld [vmem:[%s4308_s1] sm:$0xff]  ;;  %v2616_v20 = vld [vmem:[%s4308_s1 + $0xb8] sm:$0xff]  ;;  %s2799_s14 = smov 64   ;;  %s2800_s15 = smov 4  }
   0xf   :  { %2761 = vmatpush.bf16.msra.mxu3 %v2605_v7  ;;  %v2601_v15 = vld [vmem:[%s4308_s1 + $0x40] sm:$0xff]  ;;  %v157_v18 = vld [vmem:[%s4307_s0 + $0x408] sm:$0xff]  ;;  %v2624_v21 = vld [vmem:[%s4308_s1 + $0xf8] sm:$0xff] }
  0x10   :  { %972 = vmatpush.bf16.msra.mxu0 %v2597_v6  ;;  %1061 = vmatpush.bf16.msra.mxu1 %v2605_v7  ;;  %v156_v16 = vld [vmem:[%s4307_s0 + $0x400] sm:$0xff]  ;;  %v165_v19 = vld [vmem:[%s4307_s0 + $0x448] sm:$0xff]  ;;  %v2615_v30 = vld [vmem:[%s4308_s1 + $0xb0] sm:$0xff] }
  0x11   :  { %v164_v17 = vld [vmem:[%s4307_s0 + $0x440] sm:$0xff]  ;;  %v29_v24 = vld [vmem:[%s4307_s0 + $0x8] sm:$0xff]  ;;  %v349_v27 = vpack.c.bf16 %v165_v19, %v157_v18  ;;  %v2623_v31 = vld [vmem:[%s4308_s1 + $0xf0] sm:$0xff] }
  0x12   :  { %2754 = vmatpush.bf16.msra.mxu2 %v2596_v8  ;;  %v28_v22 = vld [vmem:[%s4307_s0] sm:$0xff]  ;;  %v37_v25 = vld [vmem:[%s4307_s0 + $0x48] sm:$0xff]  ;;  %v348_v26 = vpack.c.bf16 %v164_v17, %v156_v16  ;;  %v2612_v60 = vld [vmem:[%s4308_s1 + $0x98] sm:$0xff] }
  0x13   :  { %2762 = vmatpush.bf16.msra.mxu3 %v2604_v9  ;;  %v36_v23 = vld [vmem:[%s4307_s0 + $0x40] sm:$0xff]  ;;  %v285_v29 = vpack.c.bf16 %v37_v25, %v29_v24  ;;  %v2614_v32 = vld [vmem:[%s4308_s1 + $0xa8] sm:$0xff]  ;;  %v2620_v61 = vld [vmem:[%s4308_s1 + $0xd8] sm:$0xff] }
  0x14   :  { %973 = vmatpush.bf16.msra.mxu0 %v2596_v8  ;;  %1062 = vmatpush.bf16.msra.mxu1 %v2604_v9  ;;  %v284_v28 = vpack.c.bf16 %v36_v23, %v28_v22  ;;  %v2622_v33 = vld [vmem:[%s4308_s1 + $0xe8] sm:$0xff]  ;;  %v172_v34 = vld [vmem:[%s4307_s0 + $0x480] sm:$0xff] }
  0x15   :  { %v180_v35 = vld [vmem:[%s4307_s0 + $0x4c0] sm:$0xff]  ;;  %v173_v36 = vld [vmem:[%s4307_s0 + $0x488] sm:$0xff] }
  0x16   :  { %2755 = vmatpush.bf16.msra.mxu2 %v2595_v10  ;;  %v181_v37 = vld [vmem:[%s4307_s0 + $0x4c8] sm:$0xff]  ;;  %v44_v38 = vld [vmem:[%s4307_s0 + $0x80] sm:$0xff]  ;;  %v356_v42 = vpack.c.bf16 %v180_v35, %v172_v34 }
  0x17   :  { %2763 = vmatpush.bf16.msra.mxu3 %v2603_v11  ;;  %v52_v39 = vld [vmem:[%s4307_s0 + $0xc0] sm:$0xff]  ;;  %v45_v40 = vld [vmem:[%s4307_s0 + $0x88] sm:$0xff]  ;;  %v357_v43 = vpack.c.bf16 %v181_v37, %v173_v36 }
  0x18   :  { %974 = vmatpush.bf16.msra.mxu0 %v2595_v10  ;;  %1063 = vmatpush.bf16.msra.mxu1 %v2603_v11  ;;  %v53_v41 = vld [vmem:[%s4307_s0 + $0xc8] sm:$0xff]  ;;  %v292_v44 = vpack.c.bf16 %v52_v39, %v44_v38  ;;  %v2613_v46 = vld [vmem:[%s4308_s1 + $0xa0] sm:$0xff]  ;;  %v2611_v10 = vld [vmem:[%s4308_s1 + $0x90] sm:$0xff] }
  0x19   :  { %v293_v45 = vpack.c.bf16 %v53_v41, %v45_v40  ;;  %v2621_v47 = vld [vmem:[%s4308_s1 + $0xe0] sm:$0xff]  ;;  %v189_v50 = vld [vmem:[%s4307_s0 + $0x508] sm:$0xff]  ;;  %v2619_v11 = vld [vmem:[%s4308_s1 + $0xd0] sm:$0xff] }
  0x1a   :  { %2756 = vmatpush.bf16.msra.mxu2 %v2594_v12  ;;  %v188_v48 = vld [vmem:[%s4307_s0 + $0x500] sm:$0xff]  ;;  %v197_v51 = vld [vmem:[%s4307_s0 + $0x548] sm:$0xff]  ;;  %v2639_v41 = vld [vmem:[%s4308_s1 + $0x170] sm:$0xff] }
  0x1b   :  { %2764 = vmatpush.bf16.msra.mxu3 %v2602_v13  ;;  %v196_v49 = vld [vmem:[%s4307_s0 + $0x540] sm:$0xff]  ;;  %v61_v54 = vld [vmem:[%s4307_s0 + $0x108] sm:$0xff]  ;;  %v365_v57 = vpack.c.bf16 %v197_v51, %v189_v50  ;;  %v2628_v50 = vld [vmem:[%s4308_s1 + $0x118] sm:$0xff] }
  0x1c   :  { %975 = vmatpush.bf16.msra.mxu0 %v2594_v12  ;;  %1064 = vmatpush.bf16.msra.mxu1 %v2602_v13  ;;  %v60_v52 = vld [vmem:[%s4307_s0 + $0x100] sm:$0xff]  ;;  %v69_v55 = vld [vmem:[%s4307_s0 + $0x148] sm:$0xff]  ;;  %v364_v56 = vpack.c.bf16 %v196_v49, %v188_v48 }
  0x1d   :  { %v68_v53 = vld [vmem:[%s4307_s0 + $0x140] sm:$0xff]  ;;  %v301_v59 = vpack.c.bf16 %v69_v55, %v61_v54  ;;  %v205_v0 = vld [vmem:[%s4307_s0 + $0x588] sm:$0xff] }
  0x1e   :  { %2757 = vmatpush.bf16.msra.mxu2 %v2593_v14  ;;  %v300_v58 = vpack.c.bf16 %v68_v53, %v60_v52  ;;  %v204_v62 = vld [vmem:[%s4307_s0 + $0x580] sm:$0xff]  ;;  %v213_v1 = vld [vmem:[%s4307_s0 + $0x5c8] sm:$0xff]  ;;  %v2636_v53 = vld [vmem:[%s4308_s1 + $0x158] sm:$0xff] }
  0x1f   :  { %2765 = vmatpush.bf16.msra.mxu3 %v2601_v15  ;;  %v212_v63 = vld [vmem:[%s4307_s0 + $0x5c0] sm:$0xff]  ;;  %v77_v4 = vld [vmem:[%s4307_s0 + $0x188] sm:$0xff]  ;;  %v373_v7 = vpack.c.bf16 %v213_v1, %v205_v0  ;;  %v2648_v0 = vld [vmem:[%s4308_s1 + $0x1b8] sm:$0xff] }
  0x20   :  { %976 = vmatpush.bf16.msra.mxu0 %v2593_v14  ;;  %1065 = vmatpush.bf16.msra.mxu1 %v2601_v15  ;;  %v76_v2 = vld [vmem:[%s4307_s0 + $0x180] sm:$0xff]  ;;  %v85_v5 = vld [vmem:[%s4307_s0 + $0x1c8] sm:$0xff]  ;;  %v372_v6 = vpack.c.bf16 %v212_v63, %v204_v62  ;;  %v2635_v63 = vld [vmem:[%s4308_s1 + $0x150] sm:$0xff] }
  0x21   :  { %1017 = vmatmul.bf16.vlgmr.msra.gmra.mxu2 %v348_v26  ;;  %v84_v3 = vld [vmem:[%s4307_s0 + $0x1c0] sm:$0xff]  ;;  %v309_v9 = vpack.c.bf16 %v85_v5, %v77_v4  ;;  %v221_v14 = vld [vmem:[%s4307_s0 + $0x608] sm:$0xff]  ;;  %v2632_v26 = vld [vmem:[%s4308_s1 + $0x138] sm:$0xff] }
  0x22   :  { %1147 = vmatpush.bf16.msrb.mxu2 %v2616_v20  ;;  %1106 = vmatmul.bf16.vlgmr.msra.gmra.mxu3 %v349_v27  ;;  %v308_v8 = vpack.c.bf16 %v84_v3, %v76_v2  ;;  %v220_v12 = vld [vmem:[%s4307_s0 + $0x600] sm:$0xff]  ;;  %v229_v15 = vld [vmem:[%s4307_s0 + $0x648] sm:$0xff]  ;;  %v2640_v27 = vld [vmem:[%s4308_s1 + $0x178] sm:$0xff] }
  0x23   :  { %1236 = vmatpush.bf16.msrb.mxu3 %v2624_v21  ;;  %977 = vmatmul.bf16.vlgmr.msra.gmra.mxu0 %v284_v28  ;;  %v228_v13 = vld [vmem:[%s4307_s0 + $0x640] sm:$0xff]  ;;  %v93_v18 = vld [vmem:[%s4307_s0 + $0x208] sm:$0xff]  ;;  %v381_v21 = vpack.c.bf16 %v229_v15, %v221_v14  ;;  %v2631_v28 = vld [vmem:[%s4308_s1 + $0x130] sm:$0xff] }
  0x24   :  { %1066 = vmatmul.bf16.vlgmr.msra.gmra.mxu1 %v285_v29  ;;  %v92_v16 = vld [vmem:[%s4307_s0 + $0x200] sm:$0xff]  ;;  %v101_v19 = vld [vmem:[%s4307_s0 + $0x248] sm:$0xff]  ;;  %v380_v20 = vpack.c.bf16 %v228_v13, %v220_v12  ;;  %1325 = vmatpush.bf16.msrb.mxu0 %v2632_v26  ;;  %v536_v1 = vld [vmem:[%s4308_s1 + $0x1f0] sm:$0xf] }
  0x25   :  { %v100_v17 = vld [vmem:[%s4307_s0 + $0x240] sm:$0xff]  ;;  %v317_v23 = vpack.c.bf16 %v101_v19, %v93_v18  ;;  %v2610_v24 = vld [vmem:[%s4308_s1 + $0x88] sm:$0xff]  ;;  %1414 = vmatpush.bf16.msrb.mxu1 %v2640_v27  ;;  %v790_v2 = vunpack.c.l.b16 %v536_v1 }
  0x26   :  { %1148 = vmatpush.bf16.msrb.mxu2 %v2615_v30  ;;  %v316_v22 = vpack.c.bf16 %v100_v17, %v92_v16  ;;  %v2618_v25 = vld [vmem:[%s4308_s1 + $0xc8] sm:$0xff]  ;;  %v236_v29 = vld [vmem:[%s4307_s0 + $0x680] sm:$0xff] }
  0x27   :  { %1237 = vmatpush.bf16.msrb.mxu3 %v2623_v31  ;;  %v244_v30 = vld [vmem:[%s4307_s0 + $0x6c0] sm:$0xff]  ;;  %v237_v31 = vld [vmem:[%s4307_s0 + $0x688] sm:$0xff]  ;;  %v853_v4 = vpack.c.b16 %v790_v2, %v790_v2 }
  0x28   :  { %1326 = vmatpush.bf16.msrb.mxu0 %v2631_v28  ;;  %v116_v34 = vld [vmem:[%s4307_s0 + $0x2c0] sm:$0xff]  ;;  %v109_v35 = vld [vmem:[%s4307_s0 + $0x288] sm:$0xff]  ;;  %v388_v37 = vpack.c.bf16 %v244_v30, %v236_v29 }
  0x29   :  { %v117_v36 = vld [vmem:[%s4307_s0 + $0x2c8] sm:$0xff]  ;;  %1415 = vmatpush.bf16.msrb.mxu1 %v2639_v41  ;;  %v252_v48 = vld [vmem:[%s4307_s0 + $0x700] sm:$0xff] }
  0x2a   :  { %1149 = vmatpush.bf16.msrb.mxu2 %v2614_v32  ;;  %v245_v32 = vld [vmem:[%s4307_s0 + $0x6c8] sm:$0xff]  ;;  %v325_v40 = vpack.c.bf16 %v117_v36, %v109_v35  ;;  %v260_v49 = vld [vmem:[%s4307_s0 + $0x740] sm:$0xff] }
  0x2b   :  { %1238 = vmatpush.bf16.msrb.mxu3 %v2622_v33  ;;  %v108_v33 = vld [vmem:[%s4307_s0 + $0x280] sm:$0xff]  ;;  %v389_v38 = vpack.c.bf16 %v245_v32, %v237_v31  ;;  %v253_v51 = vld [vmem:[%s4307_s0 + $0x708] sm:$0xff] }
  0x2c   :  { %v324_v39 = vpack.c.bf16 %v116_v34, %v108_v33  ;;  %v261_v52 = vld [vmem:[%s4307_s0 + $0x748] sm:$0xff]  ;;  %v124_v54 = vld [vmem:[%s4307_s0 + $0x300] sm:$0xff] }
  0x2d   :  { %v132_v55 = vld [vmem:[%s4307_s0 + $0x340] sm:$0xff]  ;;  %v2626_v3 = vld [vmem:[%s4308_s1 + $0x108] sm:$0xff] }
  0x2e   :  { %1150 = vmatpush.bf16.msrb.mxu2 %v2613_v46  ;;  %v2629_v46 = vld [vmem:[%s4308_s1 + $0x120] sm:$0xff]  ;;  %v2634_v5 = vld [vmem:[%s4308_s1 + $0x148] sm:$0xff] }
  0x2f   :  { %1239 = vmatpush.bf16.msrb.mxu3 %v2621_v47  ;;  %v2637_v47 = vld [vmem:[%s4308_s1 + $0x160] sm:$0xff]  ;;  %v277_v12 = vld [vmem:[%s4307_s0 + $0x7c8] sm:$0xff] }
  0x30   :  { %v140_v13 = vld [vmem:[%s4307_s0 + $0x380] sm:$0xff]  ;;  %v141_v15 = vld [vmem:[%s4307_s0 + $0x388] sm:$0xff] }
  0x31   :  { %1022 = vmatmul.bf16.gmra.mxu2 %v356_v42  ;;  %v2609_v42 = vld [vmem:[%s4308_s1 + $0x80] sm:$0xff]  ;;  %v149_v16 = vld [vmem:[%s4307_s0 + $0x3c8] sm:$0xff] }
  0x32   :  { %1111 = vmatmul.bf16.gmra.mxu3 %v357_v43  ;;  %1151 = vmatpush.bf16.msrb.mxu2 %v2612_v60  ;;  %v2617_v43 = vld [vmem:[%s4308_s1 + $0xc0] sm:$0xff]  ;;  %v2627_v60 = vld [vmem:[%s4308_s1 + $0x110] sm:$0xff]  ;;  %v33_v27 = vld [vmem:[%s4307_s0 + $0x28] sm:$0xff] }
  0x33   :  { %982 = vmatmul.bf16.gmra.mxu0 %v292_v44  ;;  %1240 = vmatpush.bf16.msrb.mxu3 %v2620_v61  ;;  %v2630_v44 = vld [vmem:[%s4308_s1 + $0x128] sm:$0xff]  ;;  %v332_v61 = vpack.c.bf16 %v132_v55, %v124_v54  ;;  %v148_v14 = vld [vmem:[%s4307_s0 + $0x3c0] sm:$0xff] }
  0x34   :  { %1071 = vmatmul.bf16.gmra.mxu1 %v293_v45  ;;  %v2638_v45 = vld [vmem:[%s4308_s1 + $0x168] sm:$0xff]  ;;  %1327 = vmatpush.bf16.msrb.mxu0 %v2630_v44  ;;  %v340_v19 = vpack.c.bf16 %v148_v14, %v140_v13  ;;  %v40_v26 = vld [vmem:[%s4307_s0 + $0x60] sm:$0xff]  ;;  %v63_v13 = vld [vmem:[%s4307_s0 + $0x118] sm:$0xff] }
  0x35   :  { %1416 = vmatpush.bf16.msrb.mxu1 %v2638_v45  ;;  %v41_v28 = vld [vmem:[%s4307_s0 + $0x68] sm:$0xff]  ;;  %v3210_v31 = vld [vmem:[%s4309_s2] ss:$0 sm:$0xff]  ;;  %v71_v14 = vld [vmem:[%s4307_s0 + $0x158] sm:$0xff] }
  0x36   :  { %1152 = vmatpush.bf16.msrb.mxu2 %v2611_v10  ;;  %v276_v10 = vld [vmem:[%s4307_s0 + $0x7c0] sm:$0xff]  ;;  %v289_v33 = vpack.c.bf16 %v41_v28, %v33_v27 }
  0x37   :  { %1241 = vmatpush.bf16.msrb.mxu3 %v2619_v11  ;;  %v269_v11 = vld [vmem:[%s4307_s0 + $0x788] sm:$0xff]  ;;  %v56_v55 = vld [vmem:[%s4307_s0 + $0xe0] sm:$0xff] }
  0x38   :  { %1328 = vmatpush.bf16.msrb.mxu0 %v2629_v46  ;;  %v405_v18 = vpack.c.bf16 %v277_v12, %v269_v11  ;;  %v62_v11 = vld [vmem:[%s4307_s0 + $0x110] sm:$0xff] }
  0x39   :  { %1417 = vmatpush.bf16.msrb.mxu1 %v2637_v47  ;;  %v46_v47 = vld [vmem:[%s4307_s0 + $0x90] sm:$0xff] }
  0x3a   :  { %1153 = vmatpush.bf16.msrb.mxu2 %v2610_v24  ;;  %v39_v24 = vld [vmem:[%s4307_s0 + $0x58] sm:$0xff]  ;;  %v70_v12 = vld [vmem:[%s4307_s0 + $0x150] sm:$0xff] }
  0x3b   :  { %1242 = vmatpush.bf16.msrb.mxu3 %v2618_v25  ;;  %v32_v25 = vld [vmem:[%s4307_s0 + $0x20] sm:$0xff] }
  0x3c   :  { %1329 = vmatpush.bf16.msrb.mxu0 %v2628_v50  ;;  %v288_v32 = vpack.c.bf16 %v40_v26, %v32_v25  ;;  %v55_v50 = vld [vmem:[%s4307_s0 + $0xd8] sm:$0xff] }
  0x3d   :  { %1418 = vmatpush.bf16.msrb.mxu1 %v2636_v53 }
  0x3e   :  { %1154 = vmatpush.bf16.msrb.mxu2 %v2609_v42 }
  0x3f   :  { %1243 = vmatpush.bf16.msrb.mxu3 %v2617_v43  ;;  %v2654_v43 = vld [vmem:[%s4308_s1 + $0x1e8] sm:$0xff] }
  0x40   :  { %1330 = vmatpush.bf16.msrb.mxu0 %v2627_v60 }
  0x41   :  { %1027 = vmatmul.bf16.gmra.mxu2 %v364_v56  ;;  %v125_v56 = vld [vmem:[%s4307_s0 + $0x308] sm:$0xff]  ;;  %1419 = vmatpush.bf16.msrb.mxu1 %v2635_v63 }
  0x42   :  { %1116 = vmatmul.bf16.gmra.mxu3 %v365_v57  ;;  %v133_v57 = vld [vmem:[%s4307_s0 + $0x348] sm:$0xff]  ;;  %1503 = vmatpush.bf16.msra.mxu2 %v2648_v0 }
  0x43   :  { %987 = vmatmul.bf16.gmra.mxu0 %v300_v58  ;;  %v396_v58 = vpack.c.bf16 %v260_v49, %v252_v48  ;;  %v333_v62 = vpack.c.bf16 %v133_v57, %v125_v56  ;;  %v54_v48 = vld [vmem:[%s4307_s0 + $0xd0] sm:$0xff]  ;;  %v47_v49 = vld [vmem:[%s4307_s0 + $0x98] sm:$0xff]  ;;  %v49_v56 = vld [vmem:[%s4307_s0 + $0xa8] sm:$0xff] }
  0x44   :  { %1076 = vmatmul.bf16.gmra.mxu1 %v301_v59  ;;  %v397_v59 = vpack.c.bf16 %v261_v52, %v253_v51  ;;  %1331 = vmatpush.bf16.msrb.mxu0 %v2626_v3  ;;  %v48_v52 = vld [vmem:[%s4307_s0 + $0xa0] sm:$0xff]  ;;  %v57_v57 = vld [vmem:[%s4307_s0 + $0xe8] sm:$0xff]  ;;  %v295_v60 = vpack.c.bf16 %v55_v50, %v47_v49 }
  0x45   :  { %1420 = vmatpush.bf16.msrb.mxu1 %v2634_v5  ;;  %v297_v63 = vpack.c.bf16 %v57_v57, %v49_v56 }
  0x51   :  { %1032 = vmatmul.bf16.gmra.mxu2 %v372_v6  ;;  %v967_v6 = vsel %vm965_vm0, %v853_v4, 0 }
  0x52   :  { %1121 = vmatmul.bf16.gmra.mxu3 %v373_v7  ;;  %v2625_v7 = vld [vmem:[%s4308_s1 + $0x100] sm:$0xff] }
  0x53   :  { %992 = vmatmul.bf16.gmra.mxu0 %v308_v8  ;;  %1593 = vmatpush.bf16.msra.mxu3 %v967_v6  ;;  %v2633_v8 = vld [vmem:[%s4308_s1 + $0x140] sm:$0xff] }
  0x54   :  { %1081 = vmatmul.bf16.gmra.mxu1 %v309_v9  ;;  %v268_v9 = vld [vmem:[%s4307_s0 + $0x780] sm:$0xff]  ;;  %1332 = vmatpush.bf16.msrb.mxu0 %v2625_v7 }
  0x55   :  { %1421 = vmatpush.bf16.msrb.mxu1 %v2633_v8  ;;  %v404_v17 = vpack.c.bf16 %v276_v10, %v268_v9 }
  0x57   :  { %1594 = vmatpush.bf16.msra.mxu3 %v2654_v43  ;;  %v78_v43 = vld [vmem:[%s4307_s0 + $0x190] sm:$0xff] }
  0x61   :  { %1037 = vmatmul.bf16.gmra.mxu2 %v380_v20  ;;  %v341_v20 = vpack.c.bf16 %v149_v16, %v141_v15  ;;  %v64_v16 = vld [vmem:[%s4307_s0 + $0x120] sm:$0xff] }
  0x62   :  { %1126 = vmatmul.bf16.gmra.mxu3 %v381_v21  ;;  %v30_v21 = vld [vmem:[%s4307_s0 + $0x10] sm:$0xff] }
  0x63   :  { %997 = vmatmul.bf16.gmra.mxu0 %v316_v22  ;;  %v38_v22 = vld [vmem:[%s4307_s0 + $0x50] sm:$0xff] }
  0x64   :  { %1086 = vmatmul.bf16.gmra.mxu1 %v317_v23  ;;  %v31_v23 = vld [vmem:[%s4307_s0 + $0x18] sm:$0xff]  ;;  %v286_v29 = vpack.c.bf16 %v38_v22, %v30_v21  ;;  %v73_v21 = vld [vmem:[%s4307_s0 + $0x168] sm:$0xff] }
  0x65   :  { %v287_v30 = vpack.c.bf16 %v39_v24, %v31_v23  ;;  %v302_v23 = vpack.c.bf16 %v70_v12, %v62_v11  ;;  %v303_v24 = vpack.c.bf16 %v71_v14, %v63_v13  ;;  %v94_v12 = vld [vmem:[%s4307_s0 + $0x210] sm:$0xff]  ;;  %v95_v14 = vld [vmem:[%s4307_s0 + $0x218] sm:$0xff] }
  0x66   :  { %v102_v13 = vld [vmem:[%s4307_s0 + $0x250] sm:$0xff] }
  0x71   :  { %1042 = vmatmul.bf16.gmra.mxu2 %v388_v37  ;;  %v2647_v37 = vld [vmem:[%s4308_s1 + $0x1b0] sm:$0xff] }
  0x72   :  { %1131 = vmatmul.bf16.gmra.mxu3 %v389_v38  ;;  %1504 = vmatpush.bf16.msra.mxu2 %v2647_v37 }
  0x73   :  { %1002 = vmatmul.bf16.gmra.mxu0 %v324_v39 }
  0x74   :  { %1091 = vmatmul.bf16.gmra.mxu1 %v325_v40 }
  0x81   :  { %1047 = vmatmul.bf16.gmra.mxu2 %v396_v58 }
  0x82   :  { %1136 = vmatmul.bf16.gmra.mxu3 %v397_v59  ;;  %v294_v59 = vpack.c.bf16 %v54_v48, %v46_v47  ;;  %v80_v48 = vld [vmem:[%s4307_s0 + $0x1a0] sm:$0xff] }
  0x83   :  { %1007 = vmatmul.bf16.gmra.mxu0 %v332_v61 }
  0x84   :  { %1096 = vmatmul.bf16.gmra.mxu1 %v333_v62  ;;  %v296_v62 = vpack.c.bf16 %v56_v55, %v48_v52  ;;  %v88_v52 = vld [vmem:[%s4307_s0 + $0x1e0] sm:$0xff] }
  0x91   :  { %1052 = vmatmul.bf16.gmra.mxu2 %v404_v17 }
  0x92   :  { %1141 = vmatmul.bf16.gmra.mxu3 %v405_v18 }
  0x93   :  { %1012 = vmatmul.bf16.gmra.mxu0 %v340_v19  ;;  %v72_v19 = vld [vmem:[%s4307_s0 + $0x160] sm:$0xff] }
  0x94   :  { %1101 = vmatmul.bf16.gmra.mxu1 %v341_v20  ;;  %v65_v20 = vld [vmem:[%s4307_s0 + $0x128] sm:$0xff]  ;;  %v304_v26 = vpack.c.bf16 %v72_v19, %v64_v16  ;;  %v103_v16 = vld [vmem:[%s4307_s0 + $0x258] sm:$0xff] }
  0x95   :  { %v305_v27 = vpack.c.bf16 %v73_v21, %v65_v20  ;;  %v104_v21 = vld [vmem:[%s4307_s0 + $0x260] sm:$0xff] }
  0xa0   :  { %v978_v34 = vpop.f32.mrf.mxu0 }
  0xa1   :  { %v1067_v35 = vpop.f32.mrf.mxu1  ;;  %1155 = vmatmul.bf16.vlgmr.msrb.gmra.mxu2 %v286_v29  ;;  %v979_v36 = vadd.f32 %v3210_v31, %v978_v34 }
  0xa2   :  { %1244 = vmatmul.bf16.vlgmr.msrb.gmra.mxu3 %v287_v30 }
  0xa3   :  { %v3216_v38 = vadd.f32 %v1067_v35, %v979_v36  ;;  %1333 = vmatmul.bf16.vlgmr.msrb.gmra.mxu0 %v288_v32  ;;  %v2646_v32 = vld [vmem:[%s4308_s1 + $0x1a8] sm:$0xff] }
  0xa4   :  { %1422 = vmatmul.bf16.vlgmr.msrb.gmra.mxu1 %v289_v33  ;;  %v1018_v39 = vpop.f32.mrf.mxu2  ;;  %1505 = vmatpush.bf16.msra.mxu2 %v2646_v32 }
  0xa5   :  { %v1107_v40 = vpop.f32.mrf.mxu3  ;;  %v1019_v41 = vadd.f32 %v3210_v31, %v1018_v39 }
  0xa7   :  { %v3219_v42 = vadd.f32 %v1107_v40, %v1019_v41 }
  0xa8   :  { %v980_v44 = vpop.f32.mrf.mxu0 }
  0xa9   :  { %v1069_v45 = vpop.f32.mrf.mxu1  ;;  %v981_v46 = vadd.f32 %v3210_v31, %v980_v44  ;;  %v86_v44 = vld [vmem:[%s4307_s0 + $0x1d0] sm:$0xff] }
  0xaa   :  { %v310_v56 = vpack.c.bf16 %v86_v44, %v78_v43 }
  0xab   :  { %v3237_v51 = vadd.f32 %v1069_v45, %v981_v46  ;;  %v79_v45 = vld [vmem:[%s4307_s0 + $0x198] sm:$0xff] }
  0xac   :  { %v1020_v53 = vpop.f32.mrf.mxu2  ;;  %v87_v46 = vld [vmem:[%s4307_s0 + $0x1d8] sm:$0xff] }
  0xad   :  { %v1109_v54 = vpop.f32.mrf.mxu3  ;;  %v1021_v58 = vadd.f32 %v3210_v31, %v1020_v53  ;;  %v81_v53 = vld [vmem:[%s4307_s0 + $0x1a8] sm:$0xff]  ;;  %v311_v57 = vpack.c.bf16 %v87_v46, %v79_v45 }
  0xaf   :  { %v3252_v61 = vadd.f32 %v1109_v54, %v1021_v58  ;;  %v89_v54 = vld [vmem:[%s4307_s0 + $0x1e8] sm:$0xff] }
  0xb0   :  { %v983_v0 = vpop.f32.mrf.mxu0 }
  0xb1   :  { %v1072_v1 = vpop.f32.mrf.mxu1  ;;  %1160 = vmatmul.bf16.gmra.mxu2 %v294_v59  ;;  %v984_v2 = vadd.f32 %v3210_v31, %v983_v0  ;;  %v312_v59 = vpack.c.bf16 %v88_v52, %v80_v48  ;;  %v111_v52 = vld [vmem:[%s4307_s0 + $0x298] sm:$0xff] }
  0xb2   :  { %1249 = vmatmul.bf16.gmra.mxu3 %v295_v60  ;;  %v313_v60 = vpack.c.bf16 %v89_v54, %v81_v53  ;;  %v119_v53 = vld [vmem:[%s4307_s0 + $0x2d8] sm:$0xff] }
  0xb3   :  { %v3255_v3 = vadd.f32 %v1072_v1, %v984_v2  ;;  %1338 = vmatmul.bf16.gmra.mxu0 %v296_v62  ;;  %v2653_v62 = vld [vmem:[%s4308_s1 + $0x1e0] sm:$0xff] }
  0xb4   :  { %1427 = vmatmul.bf16.gmra.mxu1 %v297_v63  ;;  %v1023_v4 = vpop.f32.mrf.mxu2  ;;  %1595 = vmatpush.bf16.msra.mxu3 %v2653_v62  ;;  %v121_v62 = vld [vmem:[%s4307_s0 + $0x2e8] sm:$0xff] }
  0xb5   :  { %v1112_v5 = vpop.f32.mrf.mxu3  ;;  %v1024_v6 = vadd.f32 %v3210_v31, %v1023_v4 }
  0xb7   :  { %v3258_v7 = vadd.f32 %v1112_v5, %v1024_v6 }
  0xb8   :  { %v985_v8 = vpop.f32.mrf.mxu0 }
  0xb9   :  { %v1074_v9 = vpop.f32.mrf.mxu1  ;;  %v986_v10 = vadd.f32 %v3210_v31, %v985_v8 }
  0xbb   :  { %v3273_v15 = vadd.f32 %v1074_v9, %v986_v10 }
  0xbc   :  { %v1025_v17 = vpop.f32.mrf.mxu2 }
  0xbd   :  { %v1114_v18 = vpop.f32.mrf.mxu3  ;;  %v1026_v22 = vadd.f32 %v3210_v31, %v1025_v17 }
  0xbf   :  { %v3288_v25 = vadd.f32 %v1114_v18, %v1026_v22  ;;  %v96_v18 = vld [vmem:[%s4307_s0 + $0x220] sm:$0xff]  ;;  %v97_v22 = vld [vmem:[%s4307_s0 + $0x228] sm:$0xff] }
  0xc0   :  { %v988_v28 = vpop.f32.mrf.mxu0 }
  0xc1   :  { %v1077_v29 = vpop.f32.mrf.mxu1  ;;  %1165 = vmatmul.bf16.gmra.mxu2 %v302_v23  ;;  %v989_v30 = vadd.f32 %v3210_v31, %v988_v28  ;;  %v105_v23 = vld [vmem:[%s4307_s0 + $0x268] sm:$0xff] }
  0xc2   :  { %1254 = vmatmul.bf16.gmra.mxu3 %v303_v24 }
  0xc3   :  { %v3294_v33 = vadd.f32 %v1077_v29, %v989_v30  ;;  %1343 = vmatmul.bf16.gmra.mxu0 %v304_v26  ;;  %v318_v26 = vpack.c.bf16 %v102_v13, %v94_v12  ;;  %v320_v29 = vpack.c.bf16 %v104_v21, %v96_v18  ;;  %v321_v30 = vpack.c.bf16 %v105_v23, %v97_v22  ;;  %v2652_v12 = vld [vmem:[%s4308_s1 + $0x1d8] sm:$0xff]  ;;  %v126_v23 = vld [vmem:[%s4307_s0 + $0x310] sm:$0xff] }
  0xc4   :  { %1432 = vmatmul.bf16.gmra.mxu1 %v305_v27  ;;  %v1028_v34 = vpop.f32.mrf.mxu2  ;;  %v319_v27 = vpack.c.bf16 %v103_v16, %v95_v14  ;;  %1596 = vmatpush.bf16.msra.mxu3 %v2652_v12  ;;  %v144_v12 = vld [vmem:[%s4307_s0 + $0x3a0] sm:$0xff] }
  0xc5   :  { %v1117_v35 = vpop.f32.mrf.mxu3  ;;  %v1029_v36 = vadd.f32 %v3210_v31, %v1028_v34 }
  0xc7   :  { %v3297_v37 = vadd.f32 %v1117_v35, %v1029_v36  ;;  %v2645_v36 = vld [vmem:[%s4308_s1 + $0x1a0] sm:$0xff] }
  0xc8   :  { %v990_v39 = vpop.f32.mrf.mxu0  ;;  %1506 = vmatpush.bf16.msra.mxu2 %v2645_v36  ;;  %v129_v36 = vld [vmem:[%s4307_s0 + $0x328] sm:$0xff] }
  0xc9   :  { %v1079_v40 = vpop.f32.mrf.mxu1  ;;  %v991_v41 = vadd.f32 %v3210_v31, %v990_v39 }
  0xcb   :  { %v3312_v47 = vadd.f32 %v1079_v40, %v991_v41 }
  0xcc   :  { %v1030_v49 = vpop.f32.mrf.mxu2 }
  0xcd   :  { %v1119_v50 = vpop.f32.mrf.mxu3  ;;  %v1031_v55 = vadd.f32 %v3210_v31, %v1030_v49  ;;  %v110_v49 = vld [vmem:[%s4307_s0 + $0x290] sm:$0xff] }
  0xcf   :  { %v3327_v58 = vadd.f32 %v1119_v50, %v1031_v55  ;;  %v118_v50 = vld [vmem:[%s4307_s0 + $0x2d0] sm:$0xff]  ;;  %v112_v55 = vld [vmem:[%s4307_s0 + $0x2a0] sm:$0xff] }
  0xd0   :  { %v993_v63 = vpop.f32.mrf.mxu0 }
  0xd1   :  { %v1082_v0 = vpop.f32.mrf.mxu1  ;;  %1170 = vmatmul.bf16.gmra.mxu2 %v310_v56  ;;  %v994_v1 = vadd.f32 %v3210_v31, %v993_v63 }
  0xd2   :  { %1259 = vmatmul.bf16.gmra.mxu3 %v311_v57 }
  0xd3   :  { %v3333_v2 = vadd.f32 %v1082_v0, %v994_v1  ;;  %1348 = vmatmul.bf16.gmra.mxu0 %v312_v59  ;;  %v120_v59 = vld [vmem:[%s4307_s0 + $0x2e0] sm:$0xff]  ;;  %v326_v0 = vpack.c.bf16 %v118_v50, %v110_v49  ;;  %v327_v1 = vpack.c.bf16 %v119_v53, %v111_v52 }
  0xd4   :  { %1437 = vmatmul.bf16.gmra.mxu1 %v313_v60  ;;  %v1033_v4 = vpop.f32.mrf.mxu2  ;;  %v113_v60 = vld [vmem:[%s4307_s0 + $0x2a8] sm:$0xff] }
  0xd5   :  { %v1122_v5 = vpop.f32.mrf.mxu3  ;;  %v1034_v6 = vadd.f32 %v3210_v31, %v1033_v4 }
  0xd7   :  { %v3336_v8 = vadd.f32 %v1122_v5, %v1034_v6  ;;  %v328_v5 = vpack.c.bf16 %v120_v59, %v112_v55  ;;  %v329_v6 = vpack.c.bf16 %v121_v62, %v113_v60  ;;  %v2644_v55 = vld [vmem:[%s4308_s1 + $0x198] sm:$0xff] }
  0xd8   :  { %v995_v9 = vpop.f32.mrf.mxu0  ;;  %1507 = vmatpush.bf16.msra.mxu2 %v2644_v55  ;;  %v158_v55 = vld [vmem:[%s4307_s0 + $0x410] sm:$0xff] }
  0xd9   :  { %v1084_v10 = vpop.f32.mrf.mxu1  ;;  %v996_v11 = vadd.f32 %v3210_v31, %v995_v9 }
  0xdb   :  { %v3351_v17 = vadd.f32 %v1084_v10, %v996_v11 }
  0xdc   :  { %v1035_v19 = vpop.f32.mrf.mxu2 }
  0xdd   :  { %v1124_v20 = vpop.f32.mrf.mxu3  ;;  %v1036_v24 = vadd.f32 %v3210_v31, %v1035_v19 }
  0xdf   :  { %v3366_v28 = vadd.f32 %v1124_v20, %v1036_v24  ;;  %v134_v24 = vld [vmem:[%s4307_s0 + $0x350] sm:$0xff] }
  0xe0   :  { %v998_v32 = vpop.f32.mrf.mxu0 }
  0xe1   :  { %v1087_v34 = vpop.f32.mrf.mxu1  ;;  %1175 = vmatmul.bf16.gmra.mxu2 %v318_v26  ;;  %v999_v35 = vadd.f32 %v3210_v31, %v998_v32  ;;  %v127_v26 = vld [vmem:[%s4307_s0 + $0x318] sm:$0xff] }
  0xe2   :  { %1264 = vmatmul.bf16.gmra.mxu3 %v319_v27  ;;  %v135_v27 = vld [vmem:[%s4307_s0 + $0x358] sm:$0xff] }
  0xe3   :  { %v3372_v39 = vadd.f32 %v1087_v34, %v999_v35  ;;  %1353 = vmatmul.bf16.gmra.mxu0 %v320_v29  ;;  %v136_v35 = vld [vmem:[%s4307_s0 + $0x360] sm:$0xff] }
  0xe4   :  { %1442 = vmatmul.bf16.gmra.mxu1 %v321_v30  ;;  %v1038_v40 = vpop.f32.mrf.mxu2  ;;  %v128_v30 = vld [vmem:[%s4307_s0 + $0x320] sm:$0xff] }
  0xe5   :  { %v1127_v41 = vpop.f32.mrf.mxu3  ;;  %v1039_v43 = vadd.f32 %v3210_v31, %v1038_v40  ;;  %v137_v40 = vld [vmem:[%s4307_s0 + $0x368] sm:$0xff] }
  0xe6   :  { %v337_v49 = vpack.c.bf16 %v137_v40, %v129_v36 }
  0xe7   :  { %v3375_v44 = vadd.f32 %v1127_v41, %v1039_v43  ;;  %v334_v43 = vpack.c.bf16 %v134_v24, %v126_v23 }
  0xe8   :  { %v1000_v45 = vpop.f32.mrf.mxu0 }
  0xe9   :  { %v1089_v46 = vpop.f32.mrf.mxu1  ;;  %v1001_v48 = vadd.f32 %v3210_v31, %v1000_v45  ;;  %v335_v45 = vpack.c.bf16 %v135_v27, %v127_v26 }
  0xeb   :  { %v3390_v54 = vadd.f32 %v1089_v46, %v1001_v48  ;;  %v336_v48 = vpack.c.bf16 %v136_v35, %v128_v30 }
  0xec   :  { %v1040_v56 = vpop.f32.mrf.mxu2 }
  0xed   :  { %v1129_v57 = vpop.f32.mrf.mxu3  ;;  %v1041_v63 = vadd.f32 %v3210_v31, %v1040_v56 }
  0xef   :  { %v3405_v4 = vadd.f32 %v1129_v57, %v1041_v63 }
  0xf0   :  { %v1003_v9 = vpop.f32.mrf.mxu0 }
  0xf1   :  { %v1092_v10 = vpop.f32.mrf.mxu1  ;;  %1180 = vmatmul.bf16.gmra.mxu2 %v326_v0  ;;  %v1004_v11 = vadd.f32 %v3210_v31, %v1003_v9  ;;  %v143_v9 = vld [vmem:[%s4307_s0 + $0x398] sm:$0xff] }
  0xf2   :  { %1269 = vmatmul.bf16.gmra.mxu3 %v327_v1 }
  0xf3   :  { %v3411_v13 = vadd.f32 %v1092_v10, %v1004_v11  ;;  %1358 = vmatmul.bf16.gmra.mxu0 %v328_v5  ;;  %v142_v5 = vld [vmem:[%s4307_s0 + $0x390] sm:$0xff]  ;;  %v151_v10 = vld [vmem:[%s4307_s0 + $0x3d8] sm:$0xff] }
  0xf4   :  { %1447 = vmatmul.bf16.gmra.mxu1 %v329_v6  ;;  %v1043_v14 = vpop.f32.mrf.mxu2  ;;  %v150_v6 = vld [vmem:[%s4307_s0 + $0x3d0] sm:$0xff]  ;;  %v343_v26 = vpack.c.bf16 %v151_v10, %v143_v9  ;;  %v161_v9 = vld [vmem:[%s4307_s0 + $0x428] sm:$0xff] }
  0xf5   :  { %v1132_v16 = vpop.f32.mrf.mxu3  ;;  %v1044_v18 = vadd.f32 %v3210_v31, %v1043_v14  ;;  %v1720_v14 = vld [vmem:[%s4310_s3 + $0x38] sm:$0xff]  ;;  %v342_v24 = vpack.c.bf16 %v150_v6, %v142_v5  ;;  %v168_v6 = vld [vmem:[%s4307_s0 + $0x460] sm:$0xff]  ;;  %v169_v10 = vld [vmem:[%s4307_s0 + $0x468] sm:$0xff] }
  0xf6   :  { %1830 = vmatpush.msra.mxu0 %v1720_v14 }
  0xf7   :  { %v3414_v19 = vadd.f32 %v1132_v16, %v1044_v18 }
  0xf8   :  { %v1005_v20 = vpop.f32.mrf.mxu0 }
  0xf9   :  { %v1094_v21 = vpop.f32.mrf.mxu1  ;;  %v1006_v22 = vadd.f32 %v3210_v31, %v1005_v20  ;;  %v152_v20 = vld [vmem:[%s4307_s0 + $0x3e0] sm:$0xff] }
  0xfa   :  { %v344_v30 = vpack.c.bf16 %v152_v20, %v144_v12 }
  0xfb   :  { %v3429_v29 = vadd.f32 %v1094_v21, %v1006_v22  ;;  %v145_v21 = vld [vmem:[%s4307_s0 + $0x3a8] sm:$0xff] }
  0xfc   :  { %v1045_v32 = vpop.f32.mrf.mxu2  ;;  %v153_v22 = vld [vmem:[%s4307_s0 + $0x3e8] sm:$0xff] }
  0xfd   :  { %v1134_v34 = vpop.f32.mrf.mxu3  ;;  %v1046_v41 = vadd.f32 %v3210_v31, %v1045_v32  ;;  %v345_v32 = vpack.c.bf16 %v153_v22, %v145_v21  ;;  %v353_v21 = vpack.c.bf16 %v169_v10, %v161_v9 }
  0xff   :  { %v3444_v46 = vadd.f32 %v1134_v34, %v1046_v41 }
 0x100   :  { %v1008_v50 = vpop.f32.mrf.mxu0 }
 0x101   :  { %v1097_v52 = vpop.f32.mrf.mxu1  ;;  %1185 = vmatmul.bf16.gmra.mxu2 %v334_v43  ;;  %v1009_v53 = vadd.f32 %v3210_v31, %v1008_v50 }
 0x102   :  { %1274 = vmatmul.bf16.gmra.mxu3 %v335_v45 }
 0x103   :  { %v3450_v56 = vadd.f32 %v1097_v52, %v1009_v53  ;;  %1363 = vmatmul.bf16.gmra.mxu0 %v336_v48 }
 0x104   :  { %1452 = vmatmul.bf16.gmra.mxu1 %v337_v49  ;;  %v1048_v57 = vpop.f32.mrf.mxu2  ;;  %v2651_v49 = vld [vmem:[%s4308_s1 + $0x1d0] sm:$0xff] }
 0x105   :  { %v1137_v59 = vpop.f32.mrf.mxu3  ;;  %v1049_v60 = vadd.f32 %v3210_v31, %v1048_v57  ;;  %1597 = vmatpush.bf16.msra.mxu3 %v2651_v49  ;;  %v166_v57 = vld [vmem:[%s4307_s0 + $0x450] sm:$0xff] }
 0x106   :  { %v350_v14 = vpack.c.bf16 %v166_v57, %v158_v55  ;;  %v184_v57 = vld [vmem:[%s4307_s0 + $0x4e0] sm:$0xff] }
 0x107   :  { %v3453_v62 = vadd.f32 %v1137_v59, %v1049_v60  ;;  %v159_v59 = vld [vmem:[%s4307_s0 + $0x418] sm:$0xff] }
 0x108   :  { %v1010_v63 = vpop.f32.mrf.mxu0  ;;  %v167_v60 = vld [vmem:[%s4307_s0 + $0x458] sm:$0xff] }
 0x109   :  { %v1099_v0 = vpop.f32.mrf.mxu1  ;;  %v1011_v1 = vadd.f32 %v3210_v31, %v1010_v63 }
 0x10b   :  { %v3468_v11 = vadd.f32 %v1099_v0, %v1011_v1  ;;  %v160_v0 = vld [vmem:[%s4307_s0 + $0x420] sm:$0xff] }
 0x10c   :  { %v1050_v16 = vpop.f32.mrf.mxu2  ;;  %v352_v20 = vpack.c.bf16 %v168_v6, %v160_v0 }
 0x10d   :  { %v1139_v18 = vpop.f32.mrf.mxu3  ;;  %v1051_v23 = vadd.f32 %v3210_v31, %v1050_v16  ;;  %v351_v16 = vpack.c.bf16 %v167_v60, %v159_v59  ;;  %v177_v59 = vld [vmem:[%s4307_s0 + $0x4a8] sm:$0xff] }
 0x10e   :  { %v185_v60 = vld [vmem:[%s4307_s0 + $0x4e8] sm:$0xff] }
 0x10f   :  { %v3486_v27 = vadd.f32 %v1139_v18, %v1051_v23  ;;  %v361_v10 = vpack.c.bf16 %v185_v60, %v177_v59 }
 0x110   :  { %v1013_v34 = vpop.f32.mrf.mxu0 }
 0x111   :  { %v1102_v35 = vpop.f32.mrf.mxu1  ;;  %1190 = vmatmul.bf16.gmra.mxu2 %v342_v24  ;;  %v1014_v36 = vadd.f32 %v3210_v31, %v1013_v34  ;;  %v2643_v24 = vld [vmem:[%s4308_s1 + $0x190] sm:$0xff] }
 0x112   :  { %1279 = vmatmul.bf16.gmra.mxu3 %v343_v26  ;;  %1508 = vmatpush.bf16.msra.mxu2 %v2643_v24 }
 0x113   :  { %v3489_v40 = vadd.f32 %v1102_v35, %v1014_v36  ;;  %1368 = vmatmul.bf16.gmra.mxu0 %v344_v30 }
 0x114   :  { %1457 = vmatmul.bf16.gmra.mxu1 %v345_v32  ;;  %v1053_v41 = vpop.f32.mrf.mxu2 }
 0x115   :  { %v1142_v43 = vpop.f32.mrf.mxu3  ;;  %v1054_v45 = vadd.f32 %v3210_v31, %v1053_v41  ;;  %v174_v41 = vld [vmem:[%s4307_s0 + $0x490] sm:$0xff] }
 0x117   :  { %v3492_v48 = vadd.f32 %v1142_v43, %v1054_v45  ;;  %v182_v43 = vld [vmem:[%s4307_s0 + $0x4d0] sm:$0xff]  ;;  %v175_v45 = vld [vmem:[%s4307_s0 + $0x498] sm:$0xff] }
 0x118   :  { %v1015_v50 = vpop.f32.mrf.mxu0 }
 0x119   :  { %v1104_v52 = vpop.f32.mrf.mxu1  ;;  %v1016_v53 = vadd.f32 %v3210_v31, %v1015_v50  ;;  %v176_v50 = vld [vmem:[%s4307_s0 + $0x4a0] sm:$0xff] }
 0x11a   :  { %v360_v9 = vpack.c.bf16 %v184_v57, %v176_v50  ;;  %v193_v50 = vld [vmem:[%s4307_s0 + $0x528] sm:$0xff] }
 0x11b   :  { %v3510_v63 = vadd.f32 %v1104_v52, %v1016_v53  ;;  %v1719_v52 = vld [vmem:[%s4310_s3 + $0x30] sm:$0xff] }
 0x11c   :  { %v1055_v1 = vpop.f32.mrf.mxu2  ;;  %1831 = vmatpush.msra.mxu0 %v1719_v52  ;;  %v201_v52 = vld [vmem:[%s4307_s0 + $0x568] sm:$0xff] }
 0x11d   :  { %v1144_v5 = vpop.f32.mrf.mxu3  ;;  %v1056_v12 = vadd.f32 %v3210_v31, %v1055_v1  ;;  %v358_v1 = vpack.c.bf16 %v182_v43, %v174_v41  ;;  %v2650_v41 = vld [vmem:[%s4308_s1 + $0x1c8] sm:$0xff] }
 0x11e   :  { %1598 = vmatpush.bf16.msra.mxu3 %v2650_v41  ;;  %v209_v41 = vld [vmem:[%s4307_s0 + $0x5a8] sm:$0xff] }
 0x11f   :  { %v3525_v18 = vadd.f32 %v1144_v5, %v1056_v12 }
 0x120   :  { %v1334_v22 = vpop.f32.mrf.mxu0 }
 0x121   :  { %v1423_v23 = vpop.f32.mrf.mxu1  ;;  %1195 = vmatmul.bf16.gmra.mxu2 %v350_v14 }
 0x122   :  { %1284 = vmatmul.bf16.gmra.mxu3 %v351_v16 }
 0x123   :  { %1373 = vmatmul.bf16.gmra.mxu0 %v352_v20 }
 0x124   :  { %1462 = vmatmul.bf16.gmra.mxu1 %v353_v21  ;;  %v1156_v26 = vpop.f32.mrf.mxu2 }
 0x125   :  { %v1245_v30 = vpop.f32.mrf.mxu3  ;;  %v1157_v31 = vadd.f32 %v1156_v26, %v3216_v38  ;;  %v183_v38 = vld [vmem:[%s4307_s0 + $0x4d8] sm:$0xff] }
 0x126   :  { %v359_v5 = vpack.c.bf16 %v183_v38, %v175_v45  ;;  %v200_v38 = vld [vmem:[%s4307_s0 + $0x560] sm:$0xff] }
 0x127   :  { %v1246_v32 = vadd.f32 %v1245_v30, %v1157_v31  ;;  %v190_v31 = vld [vmem:[%s4307_s0 + $0x510] sm:$0xff] }
 0x128   :  { %v1336_v34 = vpop.f32.mrf.mxu0 }
 0x129   :  { %v1425_v35 = vpop.f32.mrf.mxu1  ;;  %v1335_v36 = vadd.f32 %v1334_v22, %v1246_v32  ;;  %v198_v32 = vld [vmem:[%s4307_s0 + $0x550] sm:$0xff] }
 0x12b   :  { %v3543_v49 = vadd.f32 %v1423_v23, %v1335_v36  ;;  %v192_v36 = vld [vmem:[%s4307_s0 + $0x520] sm:$0xff] }
 0x12c   :  { %v1158_v53 = vpop.f32.mrf.mxu2  ;;  %v368_v60 = vpack.c.bf16 %v200_v38, %v192_v36  ;;  %v216_v36 = vld [vmem:[%s4307_s0 + $0x5e0] sm:$0xff] }
 0x12d   :  { %v1247_v55 = vpop.f32.mrf.mxu3  ;;  %v1159_v0 = vadd.f32 %v1158_v53, %v3237_v51 }
 0x12f   :  { %v1248_v6 = vadd.f32 %v1247_v55, %v1159_v0  ;;  %v366_v55 = vpack.c.bf16 %v198_v32, %v190_v31  ;;  %v369_v0 = vpack.c.bf16 %v201_v52, %v193_v50  ;;  %v208_v31 = vld [vmem:[%s4307_s0 + $0x5a0] sm:$0xff]  ;;  %v1718_v32 = vld [vmem:[%s4310_s3 + $0x28] sm:$0xff] }
 0x130   :  { %v1339_v12 = vpop.f32.mrf.mxu0  ;;  %1832 = vmatpush.msra.mxu0 %v1718_v32 }
 0x131   :  { %v1428_v14 = vpop.f32.mrf.mxu1  ;;  %v1337_v16 = vadd.f32 %v1336_v34, %v1248_v6  ;;  %1200 = vmatmul.bf16.gmra.mxu2 %v358_v1  ;;  %v191_v34 = vld [vmem:[%s4307_s0 + $0x518] sm:$0xff] }
 0x132   :  { %1289 = vmatmul.bf16.gmra.mxu3 %v359_v5 }
 0x133   :  { %v3561_v20 = vadd.f32 %v1425_v35, %v1337_v16  ;;  %1378 = vmatmul.bf16.gmra.mxu0 %v360_v9  ;;  %v2642_v9 = vld [vmem:[%s4308_s1 + $0x188] sm:$0xff] }
 0x134   :  { %1467 = vmatmul.bf16.gmra.mxu1 %v361_v10  ;;  %v1161_v21 = vpop.f32.mrf.mxu2  ;;  %1509 = vmatpush.bf16.msra.mxu2 %v2642_v9 }
 0x135   :  { %v1250_v22 = vpop.f32.mrf.mxu3  ;;  %v1162_v23 = vadd.f32 %v1161_v21, %v3255_v3  ;;  %v199_v3 = vld [vmem:[%s4307_s0 + $0x558] sm:$0xff] }
 0x136   :  { %v367_v57 = vpack.c.bf16 %v199_v3, %v191_v34 }
 0x137   :  { %v1251_v24 = vadd.f32 %v1250_v22, %v1162_v23  ;;  %v206_v23 = vld [vmem:[%s4307_s0 + $0x590] sm:$0xff] }
 0x138   :  { %v1341_v51 = vpop.f32.mrf.mxu0 }
 0x139   :  { %v1430_v26 = vpop.f32.mrf.mxu1  ;;  %v1340_v30 = vadd.f32 %v1339_v12, %v1251_v24  ;;  %v214_v24 = vld [vmem:[%s4307_s0 + $0x5d0] sm:$0xff] }
 0x13a   :  { %v374_v38 = vpack.c.bf16 %v214_v24, %v206_v23  ;;  %v232_v24 = vld [vmem:[%s4307_s0 + $0x660] sm:$0xff] }
 0x13b   :  { %v3576_v35 = vadd.f32 %v1428_v14, %v1340_v30 }
 0x13c   :  { %v1163_v43 = vpop.f32.mrf.mxu2 }
 0x13d   :  { %v1252_v45 = vpop.f32.mrf.mxu3  ;;  %v1164_v53 = vadd.f32 %v1163_v43, %v3273_v15  ;;  %v217_v43 = vld [vmem:[%s4307_s0 + $0x5e8] sm:$0xff] }
 0x13f   :  { %v1253_v59 = vadd.f32 %v1252_v45, %v1164_v53  ;;  %v376_v53 = vpack.c.bf16 %v216_v36, %v208_v31 }
 0x140   :  { %v1344_v1 = vpop.f32.mrf.mxu0 }
 0x141   :  { %v1342_v5 = vadd.f32 %v1341_v51, %v1253_v59  ;;  %1205 = vmatmul.bf16.gmra.mxu2 %v366_v55  ;;  %v1433_v6 = vpop.f32.mrf.mxu1  ;;  %v207_v51 = vld [vmem:[%s4307_s0 + $0x598] sm:$0xff]  ;;  %v377_v55 = vpack.c.bf16 %v217_v43, %v209_v41  ;;  %v2649_v43 = vld [vmem:[%s4308_s1 + $0x1c0] sm:$0xff] }
 0x142   :  { %1294 = vmatmul.bf16.gmra.mxu3 %v367_v57 }
 0x143   :  { %v3597_v10 = vadd.f32 %v1430_v26, %v1342_v5  ;;  %1383 = vmatmul.bf16.gmra.mxu0 %v368_v60  ;;  %v215_v26 = vld [vmem:[%s4307_s0 + $0x5d8] sm:$0xff]  ;;  %1599 = vmatpush.bf16.msra.mxu3 %v2649_v43 }
 0x144   :  { %1472 = vmatmul.bf16.gmra.mxu1 %v369_v0  ;;  %v1166_v15 = vpop.f32.mrf.mxu2  ;;  %v375_v50 = vpack.c.bf16 %v215_v26, %v207_v51  ;;  %v225_v51 = vld [vmem:[%s4307_s0 + $0x628] sm:$0xff] }
 0x145   :  { %v1255_v12 = vpop.f32.mrf.mxu3  ;;  %v1167_v14 = vadd.f32 %v1166_v15, %v3294_v33  ;;  %v222_v15 = vld [vmem:[%s4307_s0 + $0x610] sm:$0xff]  ;;  %v233_v26 = vld [vmem:[%s4307_s0 + $0x668] sm:$0xff] }
 0x146   :  { %v385_v41 = vpack.c.bf16 %v233_v26, %v225_v51 }
 0x147   :  { %v1256_v16 = vadd.f32 %v1255_v12, %v1167_v14  ;;  %v230_v12 = vld [vmem:[%s4307_s0 + $0x650] sm:$0xff]  ;;  %v223_v14 = vld [vmem:[%s4307_s0 + $0x618] sm:$0xff] }
 0x148   :  { %v1346_v22 = vpop.f32.mrf.mxu0  ;;  %v382_v31 = vpack.c.bf16 %v230_v12, %v222_v15  ;;  %v248_v15 = vld [vmem:[%s4307_s0 + $0x6e0] sm:$0xff]  ;;  %v241_v12 = vld [vmem:[%s4307_s0 + $0x6a8] sm:$0xff] }
 0x149   :  { %v1345_v21 = vadd.f32 %v1344_v1, %v1256_v16  ;;  %v1435_v30 = vpop.f32.mrf.mxu1  ;;  %v231_v16 = vld [vmem:[%s4307_s0 + $0x658] sm:$0xff] }
 0x14a   :  { %v383_v32 = vpack.c.bf16 %v231_v16, %v223_v14  ;;  %v249_v14 = vld [vmem:[%s4307_s0 + $0x6e8] sm:$0xff] }
 0x14b   :  { %v3612_v33 = vadd.f32 %v1433_v6, %v1345_v21  ;;  %v224_v21 = vld [vmem:[%s4307_s0 + $0x620] sm:$0xff]  ;;  %v393_v51 = vpack.c.bf16 %v249_v14, %v241_v12  ;;  %v279_v12 = vld [vmem:[%s4307_s0 + $0x7d8] sm:$0xff] }
 0x14c   :  { %v1168_v34 = vpop.f32.mrf.mxu2  ;;  %v384_v36 = vpack.c.bf16 %v232_v24, %v224_v21  ;;  %v1716_v14 = vld [vmem:[%s4310_s3 + $0x18] sm:$0xff] }
 0x14d   :  { %v1257_v3 = vpop.f32.mrf.mxu3  ;;  %v1169_v45 = vadd.f32 %v1168_v34, %v3312_v47 }
 0x14f   :  { %v1258_v52 = vadd.f32 %v1257_v3, %v1169_v45 }
 0x150   :  { %v1349_v60 = vpop.f32.mrf.mxu0 }
 0x151   :  { %v1347_v57 = vadd.f32 %v1346_v22, %v1258_v52  ;;  %1210 = vmatmul.bf16.gmra.mxu2 %v374_v38  ;;  %v1438_v6 = vpop.f32.mrf.mxu1 }
 0x152   :  { %1299 = vmatmul.bf16.gmra.mxu3 %v375_v50  ;;  %v2641_v50 = vld [vmem:[%s4308_s1 + $0x180] sm:$0xff] }
 0x153   :  { %v3630_v59 = vadd.f32 %v1435_v30, %v1347_v57  ;;  %1388 = vmatmul.bf16.gmra.mxu0 %v376_v53  ;;  %1510 = vmatpush.bf16.msra.mxu2 %v2641_v50  ;;  %v265_v50 = vld [vmem:[%s4307_s0 + $0x768] sm:$0xff] }
 0x154   :  { %1477 = vmatmul.bf16.gmra.mxu1 %v377_v55  ;;  %v1171_v0 = vpop.f32.mrf.mxu2 }
 0x155   :  { %v1260_v1 = vpop.f32.mrf.mxu3  ;;  %v1172_v5 = vadd.f32 %v1171_v0, %v3333_v2  ;;  %v246_v0 = vld [vmem:[%s4307_s0 + $0x6d0] sm:$0xff] }
 0x157   :  { %v1261_v9 = vadd.f32 %v1260_v1, %v1172_v5  ;;  %v239_v1 = vld [vmem:[%s4307_s0 + $0x698] sm:$0xff] }
 0x158   :  { %v1351_v34 = vpop.f32.mrf.mxu0  ;;  %v247_v5 = vld [vmem:[%s4307_s0 + $0x6d8] sm:$0xff] }
 0x159   :  { %v1350_v47 = vadd.f32 %v1349_v60, %v1261_v9  ;;  %v1440_v45 = vpop.f32.mrf.mxu1  ;;  %v238_v60 = vld [vmem:[%s4307_s0 + $0x690] sm:$0xff] }
 0x15a   :  { %v390_v21 = vpack.c.bf16 %v246_v0, %v238_v60 }
 0x15b   :  { %v3645_v2 = vadd.f32 %v1438_v6, %v1350_v47  ;;  %v1717_v6 = vld [vmem:[%s4310_s3 + $0x20] sm:$0xff] }
 0x15c   :  { %v1173_v22 = vpop.f32.mrf.mxu2  ;;  %1833 = vmatpush.msra.mxu0 %v1717_v6 }
 0x15d   :  { %v1262_v23 = vpop.f32.mrf.mxu3  ;;  %v1174_v30 = vadd.f32 %v1173_v22, %v3351_v17  ;;  %v391_v22 = vpack.c.bf16 %v247_v5, %v239_v1 }
 0x15e   :  { %1834 = vmatpush.msra.mxu0 %v1716_v14 }
 0x15f   :  { %v1263_v3 = vadd.f32 %v1262_v23, %v1174_v30 }
 0x161   :  { %v1352_v38 = vadd.f32 %v1351_v34, %v1263_v3  ;;  %1215 = vmatmul.bf16.gmra.mxu2 %v382_v31  ;;  %v262_v34 = vld [vmem:[%s4307_s0 + $0x750] sm:$0xff]  ;;  %v255_v3 = vld [vmem:[%s4307_s0 + $0x718] sm:$0xff] }
 0x162   :  { %1304 = vmatmul.bf16.gmra.mxu3 %v383_v32 }
 0x163   :  { %v3666_v17 = vadd.f32 %v1440_v45, %v1352_v38  ;;  %1393 = vmatmul.bf16.gmra.mxu0 %v384_v36  ;;  %v263_v36 = vld [vmem:[%s4307_s0 + $0x758] sm:$0xff]  ;;  %v264_v45 = vld [vmem:[%s4307_s0 + $0x760] sm:$0xff]  ;;  %v257_v38 = vld [vmem:[%s4307_s0 + $0x728] sm:$0xff] }
 0x164   :  { %1482 = vmatmul.bf16.gmra.mxu1 %v385_v41  ;;  %v1176_v52 = vpop.f32.mrf.mxu2  ;;  %v401_v1 = vpack.c.bf16 %v265_v50, %v257_v38  ;;  %v42_v38 = vld [vmem:[%s4307_s0 + $0x70] sm:$0xff]  ;;  %v35_v50 = vld [vmem:[%s4307_s0 + $0x38] sm:$0xff] }
 0x165   :  { %v1265_v53 = vpop.f32.mrf.mxu3  ;;  %v1177_v55 = vadd.f32 %v1176_v52, %v3372_v39  ;;  %v240_v39 = vld [vmem:[%s4307_s0 + $0x6a0] sm:$0xff] }
 0x166   :  { %v392_v24 = vpack.c.bf16 %v248_v15, %v240_v39  ;;  %v271_v15 = vld [vmem:[%s4307_s0 + $0x798] sm:$0xff] }
 0x167   :  { %v3669_v57 = vadd.f32 %v1265_v53, %v1177_v55  ;;  %v399_v55 = vpack.c.bf16 %v263_v36, %v255_v3  ;;  %v1968_v36 = vld [vmem:[%s4312_s5 + $0x8] sm:$0xff] }
 0x168   :  { %2084 = vmatpush.msra.mxu1 %v1968_v36  ;;  %v66_v36 = vld [vmem:[%s4307_s0 + $0x130] sm:$0xff] }
 0x16c   :  { %v1178_v9 = vpop.f32.mrf.mxu2 }
 0x16d   :  { %v1267_v47 = vpop.f32.mrf.mxu3  ;;  %v1179_v16 = vadd.f32 %v1178_v9, %v3390_v54  ;;  %v254_v54 = vld [vmem:[%s4307_s0 + $0x710] sm:$0xff] }
 0x16e   :  { %v398_v53 = vpack.c.bf16 %v262_v34, %v254_v54 }
 0x16f   :  { %v3699_v23 = vadd.f32 %v1267_v47, %v1179_v16  ;;  %v278_v47 = vld [vmem:[%s4307_s0 + $0x7d0] sm:$0xff] }
 0x171   :  { %1220 = vmatmul.bf16.gmra.mxu2 %v390_v21 }
 0x172   :  { %1309 = vmatmul.bf16.gmra.mxu3 %v391_v22  ;;  %v280_v22 = vld [vmem:[%s4307_s0 + $0x7e0] sm:$0xff] }
 0x173   :  { %1398 = vmatmul.bf16.gmra.mxu0 %v392_v24  ;;  %v273_v24 = vld [vmem:[%s4307_s0 + $0x7a8] sm:$0xff] }
 0x174   :  { %1487 = vmatmul.bf16.gmra.mxu1 %v393_v51  ;;  %v1181_v26 = vpop.f32.mrf.mxu2  ;;  %v281_v51 = vld [vmem:[%s4307_s0 + $0x7e8] sm:$0xff] }
 0x175   :  { %v1270_v30 = vpop.f32.mrf.mxu3  ;;  %v1182_v31 = vadd.f32 %v1181_v26, %v3411_v13  ;;  %v256_v13 = vld [vmem:[%s4307_s0 + $0x720] sm:$0xff]  ;;  %v409_v3 = vpack.c.bf16 %v281_v51, %v273_v24 }
 0x176   :  { %v400_v0 = vpack.c.bf16 %v264_v45, %v256_v13  ;;  %v34_v45 = vld [vmem:[%s4307_s0 + $0x30] sm:$0xff] }
 0x177   :  { %v3702_v32 = vadd.f32 %v1270_v30, %v1182_v31  ;;  %v407_v31 = vpack.c.bf16 %v279_v12, %v271_v15  ;;  %v50_v15 = vld [vmem:[%s4307_s0 + $0xb0] sm:$0xff]  ;;  %v51_v12 = vld [vmem:[%s4307_s0 + $0xb8] sm:$0xff] }
 0x17c   :  { %v1183_v41 = vpop.f32.mrf.mxu2 }
 0x17d   :  { %v1272_v43 = vpop.f32.mrf.mxu3  ;;  %v1184_v52 = vadd.f32 %v1183_v41, %v3429_v29  ;;  %v270_v29 = vld [vmem:[%s4307_s0 + $0x790] sm:$0xff] }
 0x17e   :  { %v406_v30 = vpack.c.bf16 %v278_v47, %v270_v29 }
 0x17f   :  { %v3729_v60 = vadd.f32 %v1272_v43, %v1184_v52  ;;  %v43_v52 = vld [vmem:[%s4307_s0 + $0x78] sm:$0xff] }
 0x181   :  { %1225 = vmatmul.bf16.gmra.mxu2 %v398_v53 }
 0x182   :  { %1314 = vmatmul.bf16.gmra.mxu3 %v399_v55 }
 0x183   :  { %1403 = vmatmul.bf16.gmra.mxu0 %v400_v0  ;;  %v290_v0 = vpack.c.bf16 %v42_v38, %v34_v45 }
 0x184   :  { %1492 = vmatmul.bf16.gmra.mxu1 %v401_v1  ;;  %v1186_v5 = vpop.f32.mrf.mxu2  ;;  %v291_v1 = vpack.c.bf16 %v43_v52, %v35_v50 }
 0x185   :  { %v1275_v39 = vpop.f32.mrf.mxu3  ;;  %v1187_v6 = vadd.f32 %v1186_v5, %v3450_v56  ;;  %v272_v56 = vld [vmem:[%s4307_s0 + $0x7a0] sm:$0xff] }
 0x186   :  { %v408_v34 = vpack.c.bf16 %v280_v22, %v272_v56  ;;  %v59_v56 = vld [vmem:[%s4307_s0 + $0xf8] sm:$0xff] }
 0x187   :  { %v3732_v9 = vadd.f32 %v1275_v39, %v1187_v6  ;;  %v299_v24 = vpack.c.bf16 %v59_v56, %v51_v12 }
 0x18c   :  { %v1188_v16 = vpop.f32.mrf.mxu2 }
 0x18d   :  { %v1277_v21 = vpop.f32.mrf.mxu3  ;;  %v1189_v26 = vadd.f32 %v1188_v16, %v3468_v11 }
 0x18f   :  { %v3762_v54 = vadd.f32 %v1277_v21, %v1189_v26 }
 0x191   :  { %1230 = vmatmul.bf16.gmra.mxu2 %v406_v30 }
 0x192   :  { %1319 = vmatmul.bf16.gmra.mxu3 %v407_v31 }
 0x193   :  { %1408 = vmatmul.bf16.gmra.mxu0 %v408_v34 }
 0x194   :  { %1497 = vmatmul.bf16.gmra.mxu1 %v409_v3  ;;  %v1191_v13 = vpop.f32.mrf.mxu2  ;;  %v3811_v3 = vpop.f32.mrf.mxu0 }
 0x195   :  { %v1280_v41 = vpop.f32.mrf.mxu3  ;;  %v1192_v43 = vadd.f32 %v1191_v13, %v3489_v40  ;;  %v67_v13 = vld [vmem:[%s4307_s0 + $0x138] sm:$0xff] }
 0x197   :  { %v3768_v11 = vadd.f32 %v1280_v41, %v1192_v43 }
 0x19c   :  { %v1193_v53 = vpop.f32.mrf.mxu2 }
 0x19d   :  { %v1282_v40 = vpop.f32.mrf.mxu3  ;;  %v1194_v55 = vadd.f32 %v1193_v53, %v3510_v63  ;;  %v58_v63 = vld [vmem:[%s4307_s0 + $0xf0] sm:$0xff]  ;;  %v3829_v53 = vpop.f32.mrf.mxu0 }
 0x19e   :  { %v298_v22 = vpack.c.bf16 %v58_v63, %v50_v15 }
 0x19f   :  { %v3783_v5 = vadd.f32 %v1282_v40, %v1194_v55 }
 0x1a1   :  { %1511 = vmatmul.bf16.vlgmr.msra.gmra.mxu2 %v290_v0 }
 0x1a2   :  { %2513 = vmatmul.msk.bf16.vlgmr.msra.gmra.mxu3 %vm916_vm1, %v291_v1 }
 0x1a4   :  { %v1196_v39 = vpop.f32.mrf.mxu2 }
 0x1a5   :  { %v1285_v6 = vpop.f32.mrf.mxu3  ;;  %v1197_v29 = vadd.f32 %v1196_v39, %v3219_v42  ;;  %v1715_v42 = vld [vmem:[%s4310_s3 + $0x10] sm:$0xff]  ;;  %v3849_v12 = vpop.f32.mrf.mxu0 }
 0x1a6   :  { %1835 = vmatpush.msra.mxu0 %v1715_v42  ;;  %v82_v39 = vld [vmem:[%s4307_s0 + $0x1b0] sm:$0xff] }
 0x1a7   :  { %v3787_v47 = vadd.f32 %v1285_v6, %v1197_v29  ;;  %v83_v6 = vld [vmem:[%s4307_s0 + $0x1b8] sm:$0xff] }
 0x1a8   :  { %v91_v29 = vld [vmem:[%s4307_s0 + $0x1f8] sm:$0xff] }
 0x1ac   :  { %v1198_v14 = vpop.f32.mrf.mxu2 }
 0x1ad   :  { %v1287_v16 = vpop.f32.mrf.mxu3  ;;  %v1199_v21 = vadd.f32 %v1198_v14, %v3252_v61  ;;  %v74_v61 = vld [vmem:[%s4307_s0 + $0x170] sm:$0xff]  ;;  %v315_v14 = vpack.c.bf16 %v91_v29, %v83_v6  ;;  %v123_v6 = vld [vmem:[%s4307_s0 + $0x2f8] sm:$0xff] }
 0x1ae   :  { %v306_v38 = vpack.c.bf16 %v74_v61, %v66_v36  ;;  %v99_v36 = vld [vmem:[%s4307_s0 + $0x238] sm:$0xff] }
 0x1af   :  { %v3805_v51 = vadd.f32 %v1287_v16, %v1199_v21 }
 0x1b1   :  { %1516 = vmatmul.bf16.gmra.mxu2 %v298_v22 }
 0x1b2   :  { %2514 = vmatmul.msk.bf16.gmra.mxu3 %vm916_vm1, %v299_v24 }
 0x1b4   :  { %v1201_v26 = vpop.f32.mrf.mxu2 }
 0x1b5   :  { %v1290_v30 = vpop.f32.mrf.mxu3  ;;  %v1202_v31 = vadd.f32 %v1201_v26, %v3258_v7  ;;  %v75_v7 = vld [vmem:[%s4307_s0 + $0x178] sm:$0xff]  ;;  %v3856_v26 = vpop.f32.mrf.mxu0 }
 0x1b6   :  { %v307_v50 = vpack.c.bf16 %v75_v7, %v67_v13 }
 0x1b7   :  { %v3809_v34 = vadd.f32 %v1290_v30, %v1202_v31  ;;  %v98_v31 = vld [vmem:[%s4307_s0 + $0x230] sm:$0xff] }
 0x1bc   :  { %v1203_v41 = vpop.f32.mrf.mxu2 }
 0x1bd   :  { %v1292_v43 = vpop.f32.mrf.mxu3  ;;  %v1204_v45 = vadd.f32 %v1203_v41, %v3288_v25  ;;  %v90_v25 = vld [vmem:[%s4307_s0 + $0x1f0] sm:$0xff] }
 0x1be   :  { %v314_v42 = vpack.c.bf16 %v90_v25, %v82_v39  ;;  %v114_v39 = vld [vmem:[%s4307_s0 + $0x2b0] sm:$0xff]  ;;  %v115_v25 = vld [vmem:[%s4307_s0 + $0x2b8] sm:$0xff] }
 0x1bf   :  { %v3826_v52 = vadd.f32 %v1292_v43, %v1204_v45 }
 0x1c1   :  { %1521 = vmatmul.bf16.gmra.mxu2 %v306_v38  ;;  %v3875_v38 = vpop.f32.mrf.mxu0 }
 0x1c2   :  { %2515 = vmatmul.msk.bf16.gmra.mxu3 %vm916_vm1, %v307_v50 }
 0x1c4   :  { %v1206_v40 = vpop.f32.mrf.mxu2 }
 0x1c5   :  { %v1295_v55 = vpop.f32.mrf.mxu3  ;;  %v1207_v0 = vadd.f32 %v1206_v40, %v3297_v37  ;;  %v1714_v37 = vld [vmem:[%s4310_s3 + $0x8] sm:$0xff] }
 0x1c6   :  { %1836 = vmatpush.msra.mxu0 %v1714_v37 }
 0x1c7   :  { %v3832_v1 = vadd.f32 %v1295_v55, %v1207_v0 }
 0x1c9   :  { %v3893_v29 = vpop.f32.mrf.mxu0 }
 0x1cc   :  { %v1208_v15 = vpop.f32.mrf.mxu2 }
 0x1cd   :  { %v1297_v63 = vpop.f32.mrf.mxu3  ;;  %v1209_v56 = vadd.f32 %v1208_v15, %v3327_v58  ;;  %v106_v58 = vld [vmem:[%s4307_s0 + $0x270] sm:$0xff] }
 0x1ce   :  { %v322_v41 = vpack.c.bf16 %v106_v58, %v98_v31 }
 0x1cf   :  { %v3852_v16 = vadd.f32 %v1297_v63, %v1209_v56 }
 0x1d1   :  { %1526 = vmatmul.bf16.gmra.mxu2 %v314_v42  ;;  %v331_v42 = vpack.c.bf16 %v123_v6, %v115_v25 }
 0x1d2   :  { %2516 = vmatmul.msk.bf16.gmra.mxu3 %vm916_vm1, %v315_v14 }
 0x1d4   :  { %v1211_v21 = vpop.f32.mrf.mxu2 }
 0x1d5   :  { %v1300_v22 = vpop.f32.mrf.mxu3  ;;  %v1212_v24 = vadd.f32 %v1211_v21, %v3336_v8  ;;  %v107_v8 = vld [vmem:[%s4307_s0 + $0x278] sm:$0xff] }
 0x1d6   :  { %v323_v43 = vpack.c.bf16 %v107_v8, %v99_v36  ;;  %v130_v36 = vld [vmem:[%s4307_s0 + $0x330] sm:$0xff]  ;;  %v131_v8 = vld [vmem:[%s4307_s0 + $0x338] sm:$0xff] }
 0x1d7   :  { %v3858_v30 = vadd.f32 %v1300_v22, %v1212_v24  ;;  %v3902_v24 = vpop.f32.mrf.mxu0 }
 0x1dc   :  { %v1213_v61 = vpop.f32.mrf.mxu2 }
 0x1dd   :  { %v1302_v13 = vpop.f32.mrf.mxu3  ;;  %v1214_v7 = vadd.f32 %v1213_v61, %v3366_v28  ;;  %v122_v28 = vld [vmem:[%s4307_s0 + $0x2f0] sm:$0xff]  ;;  %v139_v61 = vld [vmem:[%s4307_s0 + $0x378] sm:$0xff] }
 0x1de   :  { %v330_v56 = vpack.c.bf16 %v122_v28, %v114_v39 }
 0x1df   :  { %v3873_v45 = vadd.f32 %v1302_v13, %v1214_v7 }
 0x1e1   :  { %1531 = vmatmul.bf16.gmra.mxu2 %v322_v41 }
 0x1e2   :  { %2517 = vmatmul.msk.bf16.gmra.mxu3 %vm916_vm1, %v323_v43  ;;  %v339_v43 = vpack.c.bf16 %v139_v61, %v131_v8 }
 0x1e4   :  { %v1216_v50 = vpop.f32.mrf.mxu2 }
 0x1e5   :  { %v1305_v40 = vpop.f32.mrf.mxu3  ;;  %v1217_v55 = vadd.f32 %v1216_v50, %v3375_v44  ;;  %v1713_v44 = vld [vmem:[%s4310_s3] sm:$0xff]  ;;  %v3920_v50 = vpop.f32.mrf.mxu0 }
 0x1e6   :  { %1837 = vmatpush.msra.mxu0 %v1713_v44  ;;  %v154_v44 = vld [vmem:[%s4307_s0 + $0x3f0] sm:$0xff] }
 0x1e7   :  { %v3879_v0 = vadd.f32 %v1305_v40, %v1217_v55 }
 0x1ec   :  { %v1218_v37 = vpop.f32.mrf.mxu2 }
 0x1ed   :  { %v1307_v15 = vpop.f32.mrf.mxu3  ;;  %v1219_v63 = vadd.f32 %v1218_v37, %v3405_v4  ;;  %v138_v4 = vld [vmem:[%s4307_s0 + $0x370] sm:$0xff]  ;;  %v3928_v6 = vpop.f32.mrf.mxu0  ;;  %v147_v37 = vld [vmem:[%s4307_s0 + $0x3b8] sm:$0xff] }
 0x1ee   :  { %v338_v41 = vpack.c.bf16 %v138_v4, %v130_v36 }
 0x1ef   :  { %v3899_v14 = vadd.f32 %v1307_v15, %v1219_v63 }
 0x1f1   :  { %1536 = vmatmul.bf16.gmra.mxu2 %v330_v56 }
 0x1f2   :  { %2518 = vmatmul.msk.bf16.gmra.mxu3 %vm916_vm1, %v331_v42 }
 0x1f4   :  { %v1221_v21 = vpop.f32.mrf.mxu2 }
 0x1f5   :  { %v1310_v22 = vpop.f32.mrf.mxu3  ;;  %v1222_v31 = vadd.f32 %v1221_v21, %v3414_v19  ;;  %v3949_v36 = vpop.f32.mrf.mxu0 }
 0x1f7   :  { %v3905_v58 = vadd.f32 %v1310_v22, %v1222_v31  ;;  %v1967_v31 = vld [vmem:[%s4312_s5] sm:$0xff] }
 0x1f8   :  { %2085 = vmatpush.msra.mxu1 %v1967_v31  ;;  %v179_v31 = vld [vmem:[%s4307_s0 + $0x4b8] sm:$0xff] }
 0x1fc   :  { %v1223_v13 = vpop.f32.mrf.mxu2 }
 0x1fd   :  { %v1312_v19 = vpop.f32.mrf.mxu3  ;;  %v1224_v7 = vadd.f32 %v1223_v13, %v3444_v46  ;;  %v146_v46 = vld [vmem:[%s4307_s0 + $0x3b0] sm:$0xff] }
 0x1fe   :  { %v346_v42 = vpack.c.bf16 %v154_v44, %v146_v46 }
 0x1ff   :  { %v3922_v40 = vadd.f32 %v1312_v19, %v1224_v7  ;;  %v170_v19 = vld [vmem:[%s4307_s0 + $0x470] sm:$0xff]  ;;  %v163_v7 = vld [vmem:[%s4307_s0 + $0x438] sm:$0xff] }
 0x201   :  { %1541 = vmatmul.bf16.gmra.mxu2 %v338_v41  ;;  %v171_v41 = vld [vmem:[%s4307_s0 + $0x478] sm:$0xff] }
 0x202   :  { %2519 = vmatmul.msk.bf16.gmra.mxu3 %vm916_vm1, %v339_v43  ;;  %v355_v46 = vpack.c.bf16 %v171_v41, %v163_v7  ;;  %v3989_v41 = vpop.f32.mrf.mxu1 }
 0x204   :  { %v1226_v55 = vpop.f32.mrf.mxu2 }
 0x205   :  { %v1315_v39 = vpop.f32.mrf.mxu3  ;;  %v1227_v28 = vadd.f32 %v1226_v55, %v3453_v62  ;;  %v155_v62 = vld [vmem:[%s4307_s0 + $0x3f8] sm:$0xff]  ;;  %v3966_v55 = vpop.f32.mrf.mxu0 }
 0x206   :  { %v347_v21 = vpack.c.bf16 %v155_v62, %v147_v37 }
 0x207   :  { %v3926_v25 = vadd.f32 %v1315_v39, %v1227_v28 }
 0x20c   :  { %v1228_v15 = vpop.f32.mrf.mxu2 }
 0x20d   :  { %v1317_v63 = vpop.f32.mrf.mxu3  ;;  %v1229_v56 = vadd.f32 %v1228_v15, %v3486_v27  ;;  %v162_v27 = vld [vmem:[%s4307_s0 + $0x430] sm:$0xff] }
 0x20e   :  { %v354_v28 = vpack.c.bf16 %v170_v19, %v162_v27 }
 0x20f   :  { %v3943_v22 = vadd.f32 %v1317_v63, %v1229_v56  ;;  %v3973_v63 = vpop.f32.mrf.mxu0 }
 0x211   :  { %1546 = vmatmul.bf16.gmra.mxu2 %v346_v42 }
 0x212   :  { %2520 = vmatmul.msk.bf16.gmra.mxu3 %vm916_vm1, %v347_v21  ;;  %v186_v21 = vld [vmem:[%s4307_s0 + $0x4f0] sm:$0xff] }
 0x214   :  { %v1231_v4 = vpop.f32.mrf.mxu2 }
 0x215   :  { %v1320_v8 = vpop.f32.mrf.mxu3  ;;  %v1232_v61 = vadd.f32 %v1231_v4, %v3492_v48 }
 0x217   :  { %v3952_v13 = vadd.f32 %v1320_v8, %v1232_v61 }
 0x21c   :  { %v1233_v43 = vpop.f32.mrf.mxu2 }
 0x21d   :  { %v1322_v48 = vpop.f32.mrf.mxu3  ;;  %v1234_v39 = vadd.f32 %v1233_v43, %v3525_v18  ;;  %v178_v18 = vld [vmem:[%s4307_s0 + $0x4b0] sm:$0xff]  ;;  %v3991_v43 = vpop.f32.mrf.mxu0 }
 0x21e   :  { %v362_v27 = vpack.c.bf16 %v186_v21, %v178_v18  ;;  %v4008_v18 = vpop.f32.mrf.mxu1 }
 0x21f   :  { %v3969_v44 = vadd.f32 %v1322_v48, %v1234_v39 }
 0x221   :  { %1551 = vmatmul.bf16.gmra.mxu2 %v354_v28 }
 0x222   :  { %2521 = vmatmul.msk.bf16.gmra.mxu3 %vm916_vm1, %v355_v46 }
 0x224   :  { %v1512_v37 = vpop.f32.mrf.mxu2 }
 0x225   :  { %v1601_v62 = vpop.f32.mrf.mxu3  ;;  %v1513_v15 = vadd.f32 %v1512_v37, %v3543_v49  ;;  %v187_v49 = vld [vmem:[%s4307_s0 + $0x4f8] sm:$0xff] }
 0x226   :  { %v363_v19 = vpack.c.bf16 %v187_v49, %v179_v31 }
 0x227   :  { %v1602_v56 = vadd.f32 %v1601_v62, %v1513_v15  ;;  %v202_v15 = vld [vmem:[%s4307_s0 + $0x570] sm:$0xff] }
 0x229   :  { %v1681_v42 = vmax.f32 %v1602_v56, 0.0  ;;  %v195_v56 = vld [vmem:[%s4307_s0 + $0x538] sm:$0xff] }
 0x22b   :  { %2529 = vmatmul.msk.f32.vlgmr.msra.gmra.mxu0 %vm1725_vm2, %v1681_v42  ;;  %v203_v42 = vld [vmem:[%s4307_s0 + $0x578] sm:$0xff] }
 0x22c   :  { %v1514_v4 = vpop.f32.mrf.mxu2 }
 0x22d   :  { %v1603_v8 = vpop.f32.mrf.mxu3  ;;  %v1515_v61 = vadd.f32 %v1514_v4, %v3561_v20  ;;  %v194_v20 = vld [vmem:[%s4307_s0 + $0x530] sm:$0xff] }
 0x22e   :  { %v370_v4 = vpack.c.bf16 %v202_v15, %v194_v20  ;;  %v211_v20 = vld [vmem:[%s4307_s0 + $0x5b8] sm:$0xff] }
 0x22f   :  { %v1604_v7 = vadd.f32 %v1603_v8, %v1515_v61  ;;  %v371_v8 = vpack.c.bf16 %v203_v42, %v195_v56  ;;  %v219_v15 = vld [vmem:[%s4307_s0 + $0x5f8] sm:$0xff] }
 0x231   :  { %v1682_v48 = vmax.f32 %v1604_v7, 0.0  ;;  %1556 = vmatmul.bf16.gmra.mxu2 %v362_v27 }
 0x232   :  { %2522 = vmatmul.msk.bf16.gmra.mxu3 %vm916_vm1, %v363_v19 }
 0x233   :  { %2530 = vmatmul.msk.f32.gmra.mxu0 %vm1725_vm2, %v1682_v48  ;;  %v4016_v48 = vpop.f32.mrf.mxu1 }
 0x234   :  { %v1517_v39 = vpop.f32.mrf.mxu2 }
 0x235   :  { %v1606_v28 = vpop.f32.mrf.mxu3  ;;  %v1518_v46 = vadd.f32 %v1517_v39, %v3576_v35  ;;  %v4010_v35 = vpop.f32.mrf.mxu0 }
 0x237   :  { %v1607_v37 = vadd.f32 %v1606_v28, %v1518_v46 }
 0x239   :  { %v1683_v62 = vmax.f32 %v1607_v37, 0.0 }
 0x23b   :  { %2531 = vmatmul.msk.f32.gmra.mxu0 %vm1725_vm2, %v1683_v62  ;;  %v218_v62 = vld [vmem:[%s4307_s0 + $0x5f0] sm:$0xff] }
 0x23c   :  { %v1519_v21 = vpop.f32.mrf.mxu2 }
 0x23d   :  { %v1608_v31 = vpop.f32.mrf.mxu3  ;;  %v1520_v49 = vadd.f32 %v1519_v21, %v3597_v10  ;;  %v4018_v39 = vpop.f32.mrf.mxu0  ;;  %v210_v10 = vld [vmem:[%s4307_s0 + $0x5b0] sm:$0xff] }
 0x23e   :  { %v378_v21 = vpack.c.bf16 %v218_v62, %v210_v10  ;;  %v226_v10 = vld [vmem:[%s4307_s0 + $0x630] sm:$0xff] }
 0x23f   :  { %v1609_v61 = vadd.f32 %v1608_v31, %v1520_v49  ;;  %v379_v31 = vpack.c.bf16 %v219_v15, %v211_v20  ;;  %v4035_v49 = vpop.f32.mrf.mxu1  ;;  %v234_v62 = vld [vmem:[%s4307_s0 + $0x670] sm:$0xff]  ;;  %v227_v20 = vld [vmem:[%s4307_s0 + $0x638] sm:$0xff] }
 0x241   :  { %v1684_v27 = vmax.f32 %v1609_v61, 0.0  ;;  %1561 = vmatmul.bf16.gmra.mxu2 %v370_v4 }
 0x242   :  { %2523 = vmatmul.msk.bf16.gmra.mxu3 %vm916_vm1, %v371_v8 }
 0x243   :  { %2532 = vmatmul.msk.f32.gmra.mxu0 %vm1725_vm2, %v1684_v27 }
 0x244   :  { %v1522_v19 = vpop.f32.mrf.mxu2 }
 0x245   :  { %v1611_v7 = vpop.f32.mrf.mxu3  ;;  %v1523_v28 = vadd.f32 %v1522_v19, %v3612_v33  ;;  %v4037_v4 = vpop.f32.mrf.mxu0 }
 0x247   :  { %v1612_v46 = vadd.f32 %v1611_v7, %v1523_v28 }
 0x249   :  { %v1685_v37 = vmax.f32 %v1612_v46, 0.0  ;;  %v4042_v46 = vpop.f32.mrf.mxu1 }
 0x24b   :  { %2533 = vmatmul.msk.f32.gmra.mxu0 %vm1725_vm2, %v1685_v37 }
 0x24c   :  { %v1524_v33 = vpop.f32.mrf.mxu2 }
 0x24d   :  { %v1613_v56 = vpop.f32.mrf.mxu3  ;;  %v1525_v42 = vadd.f32 %v1524_v33, %v3630_v59  ;;  %v4044_v59 = vpop.f32.mrf.mxu0 }
 0x24f   :  { %v1614_v8 = vadd.f32 %v1613_v56, %v1525_v42  ;;  %v386_v42 = vpack.c.bf16 %v234_v62, %v226_v10  ;;  %v1357_v10 = vadd.f32 %v3829_v53, %v3699_v23  ;;  %v242_v62 = vld [vmem:[%s4307_s0 + $0x6b0] sm:$0xff] }
 0x251   :  { %v1686_v61 = vmax.f32 %v1614_v8, 0.0  ;;  %1566 = vmatmul.bf16.gmra.mxu2 %v378_v21  ;;  %v1446_v23 = vadd.f32 %v4008_v18, %v1357_v10  ;;  %v1362_v10 = vadd.f32 %v3856_v26, %v3729_v60  ;;  %v267_v60 = vld [vmem:[%s4307_s0 + $0x778] sm:$0xff] }
 0x252   :  { %2524 = vmatmul.msk.bf16.gmra.mxu3 %vm916_vm1, %v379_v31  ;;  %v1355_v31 = vadd.f32 %v3811_v3, %v3669_v57 }
 0x253   :  { %2534 = vmatmul.msk.f32.gmra.mxu0 %vm1725_vm2, %v1686_v61  ;;  %v1451_v26 = vadd.f32 %v4035_v49, %v1362_v10  ;;  %v282_v10 = vld [vmem:[%s4307_s0 + $0x7f0] sm:$0xff] }
 0x254   :  { %v1527_v27 = vpop.f32.mrf.mxu2 }
 0x255   :  { %v1616_v19 = vpop.f32.mrf.mxu3  ;;  %v1528_v7 = vadd.f32 %v1527_v27, %v3645_v2  ;;  %v235_v2 = vld [vmem:[%s4307_s0 + $0x678] sm:$0xff]  ;;  %v1444_v27 = vadd.f32 %v3989_v41, %v1355_v31  ;;  %v250_v41 = vld [vmem:[%s4307_s0 + $0x6f0] sm:$0xff] }
 0x256   :  { %v387_v21 = vpack.c.bf16 %v235_v2, %v227_v20  ;;  %v243_v20 = vld [vmem:[%s4307_s0 + $0x6b8] sm:$0xff] }
 0x257   :  { %v1617_v28 = vadd.f32 %v1616_v19, %v1528_v7  ;;  %v4064_v19 = vpop.f32.mrf.mxu1  ;;  %v4066_v7 = vpop.f32.mrf.mxu0  ;;  %v251_v2 = vld [vmem:[%s4307_s0 + $0x6f8] sm:$0xff] }
 0x258   :  { %v395_v31 = vpack.c.bf16 %v251_v2, %v243_v20 }
 0x259   :  { %v1687_v37 = vmax.f32 %v1617_v28, 0.0 }
 0x25b   :  { %2535 = vmatmul.msk.f32.gmra.mxu0 %vm1725_vm2, %v1687_v37 }
 0x25c   :  { %v1529_v15 = vpop.f32.mrf.mxu2 }
 0x25d   :  { %v1618_v33 = vpop.f32.mrf.mxu3  ;;  %v1530_v56 = vadd.f32 %v1529_v15, %v3666_v17 }
 0x25f   :  { %v1619_v8 = vadd.f32 %v1618_v33, %v1530_v56  ;;  %v4085_v33 = vpop.f32.mrf.mxu1  ;;  %v4087_v56 = vpop.f32.mrf.mxu0 }
 0x261   :  { %v1688_v61 = vmax.f32 %v1619_v8, 0.0  ;;  %1571 = vmatmul.bf16.gmra.mxu2 %v386_v42  ;;  %v1360_v8 = vadd.f32 %v3849_v12, %v3702_v32  ;;  %v258_v12 = vld [vmem:[%s4307_s0 + $0x730] sm:$0xff] }
 0x262   :  { %2525 = vmatmul.msk.bf16.gmra.mxu3 %vm916_vm1, %v387_v21  ;;  %v394_v21 = vpack.c.bf16 %v250_v41, %v242_v62  ;;  %v259_v41 = vld [vmem:[%s4307_s0 + $0x738] sm:$0xff] }
 0x263   :  { %2536 = vmatmul.msk.f32.gmra.mxu0 %vm1725_vm2, %v1688_v61  ;;  %v1449_v18 = vadd.f32 %v4016_v48, %v1360_v8  ;;  %v266_v48 = vld [vmem:[%s4307_s0 + $0x770] sm:$0xff] }
 0x264   :  { %v1532_v28 = vpop.f32.mrf.mxu2 }
 0x265   :  { %v1621_v17 = vpop.f32.mrf.mxu3  ;;  %v1533_v37 = vadd.f32 %v1532_v28, %v1444_v27 }
 0x267   :  { %v1622_v57 = vadd.f32 %v1621_v17, %v1533_v37 }
 0x269   :  { %v1689_v3 = vmax.f32 %v1622_v57, 0.0  ;;  %v1460_v57 = vpop.f32.mrf.mxu1 }
 0x26b   :  { %2537 = vmatmul.msk.f32.gmra.mxu0 %vm1725_vm2, %v1689_v3  ;;  %v4096_v3 = vpop.f32.mrf.mxu0 }
 0x26c   :  { %v1534_v53 = vpop.f32.mrf.mxu2 }
 0x26d   :  { %v1623_v15 = vpop.f32.mrf.mxu3  ;;  %v1535_v42 = vadd.f32 %v1534_v53, %v1446_v23  ;;  %v402_v53 = vpack.c.bf16 %v266_v48, %v258_v12 }
 0x26f   :  { %v1624_v61 = vadd.f32 %v1623_v15, %v1535_v42  ;;  %v403_v15 = vpack.c.bf16 %v267_v60, %v259_v41  ;;  %v1365_v42 = vadd.f32 %v3875_v38, %v3732_v9  ;;  %v274_v38 = vld [vmem:[%s4307_s0 + $0x7b0] sm:$0xff] }
 0x270   :  { %v410_v60 = vpack.c.bf16 %v282_v10, %v274_v38 }
 0x271   :  { %v1690_v27 = vmax.f32 %v1624_v61, 0.0  ;;  %1576 = vmatmul.bf16.gmra.mxu2 %v394_v21  ;;  %v1454_v49 = vadd.f32 %v4042_v46, %v1365_v42  ;;  %v275_v46 = vld [vmem:[%s4307_s0 + $0x7b8] sm:$0xff] }
 0x272   :  { %2526 = vmatmul.msk.bf16.gmra.mxu3 %vm916_vm1, %v395_v31  ;;  %v1463_v31 = vpop.f32.mrf.mxu1 }
 0x273   :  { %2538 = vmatmul.msk.f32.gmra.mxu0 %vm1725_vm2, %v1690_v27  ;;  %v4114_v8 = vpop.f32.mrf.mxu0 }
 0x274   :  { %v1537_v28 = vpop.f32.mrf.mxu2 }
 0x275   :  { %v1626_v17 = vpop.f32.mrf.mxu3  ;;  %v1538_v37 = vadd.f32 %v1537_v28, %v1449_v18 }
 0x277   :  { %v1627_v62 = vadd.f32 %v1626_v17, %v1538_v37  ;;  %v1367_v17 = vadd.f32 %v3893_v29, %v3762_v54 }
 0x279   :  { %v1691_v32 = vmax.f32 %v1627_v62, 0.0  ;;  %v283_v62 = vld [vmem:[%s4307_s0 + $0x7f8] sm:$0xff]  ;;  %v1456_v54 = vadd.f32 %v4064_v19, %v1367_v17 }
 0x27a   :  { %v1465_v29 = vpop.f32.mrf.mxu1 }
 0x27b   :  { %2539 = vmatmul.msk.f32.gmra.mxu0 %vm1725_vm2, %v1691_v32  ;;  %v4134_v32 = vpop.f32.mrf.mxu0 }
 0x27c   :  { %v1539_v20 = vpop.f32.mrf.mxu2 }
 0x27d   :  { %v1628_v2 = vpop.f32.mrf.mxu3  ;;  %v1540_v23 = vadd.f32 %v1539_v20, %v1451_v26  ;;  %v411_v26 = vpack.c.bf16 %v283_v62, %v275_v46  ;;  %v1370_v20 = vadd.f32 %v3902_v24, %v3768_v11 }
 0x27f   :  { %v1629_v21 = vadd.f32 %v1628_v2, %v1540_v23  ;;  %v1459_v19 = vadd.f32 %v4085_v33, %v1370_v20  ;;  %v1375_v33 = vadd.f32 %v3928_v6, %v3787_v47 }
 0x281   :  { %v1692_v61 = vmax.f32 %v1629_v21, 0.0  ;;  %1581 = vmatmul.bf16.gmra.mxu2 %v402_v53  ;;  %v1464_v46 = vadd.f32 %v1463_v31, %v1375_v33 }
 0x282   :  { %2527 = vmatmul.msk.bf16.gmra.mxu3 %vm916_vm1, %v403_v15  ;;  %v1468_v42 = vpop.f32.mrf.mxu1 }
 0x283   :  { %2540 = vmatmul.msk.f32.gmra.mxu0 %vm1725_vm2, %v1692_v61  ;;  %v4142_v61 = vpop.f32.mrf.mxu0 }
 0x284   :  { %v1542_v27 = vpop.f32.mrf.mxu2 }
 0x285   :  { %v1631_v18 = vpop.f32.mrf.mxu3  ;;  %v1543_v28 = vadd.f32 %v1542_v27, %v1454_v49  ;;  %v1372_v49 = vadd.f32 %v3920_v50, %v3783_v5 }
 0x287   :  { %v1632_v37 = vadd.f32 %v1631_v18, %v1543_v28  ;;  %v1461_v24 = vadd.f32 %v1460_v57, %v1372_v49  ;;  %v4155_v57 = vld [vmem:[%s4311_s4] ss:$0 sm:$0xff] }
 0x289   :  { %v1693_v9 = vmax.f32 %v1632_v37, 0.0 }
 0x28a   :  { %v1470_v37 = vpop.f32.mrf.mxu1 }
 0x28b   :  { %2541 = vmatmul.msk.f32.gmra.mxu0 %vm1725_vm2, %v1693_v9  ;;  %v4149_v38 = vpop.f32.mrf.mxu0 }
 0x28c   :  { %v1544_v12 = vpop.f32.mrf.mxu2 }
 0x28d   :  { %v1633_v48 = vpop.f32.mrf.mxu3  ;;  %v1545_v41 = vadd.f32 %v1544_v12, %v1456_v54  ;;  %v1377_v54 = vadd.f32 %v3949_v36, %v3805_v51 }
 0x28f   :  { %v1634_v2 = vadd.f32 %v1633_v48, %v1545_v41  ;;  %v1466_v31 = vadd.f32 %v1465_v29, %v1377_v54 }
 0x291   :  { %v1694_v23 = vmax.f32 %v1634_v2, 0.0  ;;  %1586 = vmatmul.bf16.gmra.mxu2 %v410_v60 }
 0x292   :  { %2528 = vmatmul.msk.bf16.gmra.mxu3 %vm916_vm1, %v411_v26  ;;  %v1473_v12 = vpop.f32.mrf.mxu1 }
 0x293   :  { %2542 = vmatmul.msk.f32.gmra.mxu0 %vm1725_vm2, %v1694_v23  ;;  %v1380_v23 = vadd.f32 %v3966_v55, %v3809_v34 }
 0x294   :  { %v1547_v53 = vpop.f32.mrf.mxu2 }
 0x295   :  { %v1636_v15 = vpop.f32.mrf.mxu3  ;;  %v1548_v21 = vadd.f32 %v1547_v53, %v1459_v19 }
 0x297   :  { %v1637_v27 = vadd.f32 %v1636_v15, %v1548_v21  ;;  %v1469_v15 = vadd.f32 %v1468_v42, %v1380_v23 }
 0x299   :  { %v1695_v11 = vmax.f32 %v1637_v27, 0.0 }
 0x29a   :  { %v1475_v21 = vpop.f32.mrf.mxu1 }
 0x29b   :  { %2543 = vmatmul.msk.f32.gmra.mxu0 %vm1725_vm2, %v1695_v11 }
 0x29c   :  { %v1549_v18 = vpop.f32.mrf.mxu2 }
 0x29d   :  { %v1638_v28 = vpop.f32.mrf.mxu3  ;;  %v1550_v17 = vadd.f32 %v1549_v18, %v1461_v24  ;;  %v1382_v24 = vadd.f32 %v3973_v63, %v3826_v52 }
 0x29f   :  { %v1639_v9 = vadd.f32 %v1638_v28, %v1550_v17  ;;  %v1471_v17 = vadd.f32 %v1470_v37, %v1382_v24  ;;  %v1392_v24 = vadd.f32 %v4037_v4, %v3873_v45 }
 0x2a1   :  { %v1696_v10 = vmax.f32 %v1639_v9, 0.0 }
 0x2a3   :  { %2544 = vmatmul.msk.f32.gmra.mxu0 %vm1725_vm2, %v1696_v10  ;;  %v1478_v10 = vpop.f32.mrf.mxu1 }
 0x2a4   :  { %v1552_v5 = vpop.f32.mrf.mxu2 }
 0x2a5   :  { %v1641_v50 = vpop.f32.mrf.mxu3  ;;  %v1553_v62 = vadd.f32 %v1552_v5, %v1464_v46  ;;  %v1385_v5 = vadd.f32 %v3991_v43, %v3832_v1 }
 0x2a7   :  { %v1642_v47 = vadd.f32 %v1641_v50, %v1553_v62  ;;  %v1474_v54 = vadd.f32 %v1473_v12, %v1385_v5 }
 0x2a8   :  { %v1839_v6 = vpop.f32.mrf.mxu0 }
 0x2a9   :  { %v1697_v48 = vmax.f32 %v1642_v47, 0.0  ;;  %v1840_v41 = vadd.f32 %v4155_v57, %v1839_v6 }
 0x2ab   :  { %v1935_v60 = vmax.f32 %v1840_v41, 0.0  ;;  %2545 = vmatmul.msk.f32.gmra.mxu0 %vm1725_vm2, %v1697_v48  ;;  %v1387_v41 = vadd.f32 %v4010_v35, %v3852_v16 }
 0x2ac   :  { %v1554_v26 = vpop.f32.mrf.mxu2 }
 0x2ad   :  { %v1643_v20 = vpop.f32.mrf.mxu3  ;;  %v1555_v2 = vadd.f32 %v1554_v26, %v1466_v31  ;;  %2561 = vmatmul.msk.f32.vlgmr.msra.gmra.mxu1 %vm1973_vm3, %v1935_v60  ;;  %v1480_v31 = vpop.f32.mrf.mxu1 }
 0x2af   :  { %v1644_v51 = vadd.f32 %v1643_v20, %v1555_v2  ;;  %v1476_v20 = vadd.f32 %v1475_v21, %v1387_v41 }
 0x2b0   :  { %v1842_v36 = vpop.f32.mrf.mxu0 }
 0x2b1   :  { %v1698_v19 = vmax.f32 %v1644_v51, 0.0  ;;  %v1843_v53 = vadd.f32 %v4155_v57, %v1842_v36  ;;  %v1390_v36 = vadd.f32 %v4018_v39, %v3858_v30 }
 0x2b3   :  { %v1936_v49 = vmax.f32 %v1843_v53, 0.0  ;;  %2546 = vmatmul.msk.f32.gmra.mxu0 %vm1725_vm2, %v1698_v19 }
 0x2b4   :  { %v1557_v29 = vpop.f32.mrf.mxu2 }
 0x2b5   :  { %v1646_v27 = vpop.f32.mrf.mxu3  ;;  %v1558_v11 = vadd.f32 %v1557_v29, %v1469_v15  ;;  %2562 = vmatmul.msk.f32.gmra.mxu1 %vm1973_vm3, %v1936_v49  ;;  %v1483_v35 = vpop.f32.mrf.mxu1  ;;  %v1479_v49 = vadd.f32 %v1478_v10, %v1390_v36  ;;  %v1395_v10 = vadd.f32 %v4044_v59, %v3879_v0 }
 0x2b7   :  { %v1647_v18 = vadd.f32 %v1646_v27, %v1558_v11 }
 0x2b8   :  { %v1845_v34 = vpop.f32.mrf.mxu0 }
 0x2b9   :  { %v1699_v55 = vmax.f32 %v1647_v18, 0.0  ;;  %v1846_v28 = vadd.f32 %v4155_v57, %v1845_v34 }
 0x2bb   :  { %v1937_v33 = vmax.f32 %v1846_v28, 0.0  ;;  %2547 = vmatmul.msk.f32.gmra.mxu0 %vm1725_vm2, %v1699_v55  ;;  %v1481_v55 = vadd.f32 %v1480_v31, %v1392_v24 }
 0x2bc   :  { %v1559_v42 = vpop.f32.mrf.mxu2 }
 0x2bd   :  { %v1648_v9 = vpop.f32.mrf.mxu3  ;;  %v1560_v46 = vadd.f32 %v1559_v42, %v1471_v17  ;;  %2563 = vmatmul.msk.f32.gmra.mxu1 %vm1973_vm3, %v1937_v33  ;;  %v1485_v28 = vpop.f32.mrf.mxu1 }
 0x2bf   :  { %v1649_v50 = vadd.f32 %v1648_v9, %v1560_v46 }
 0x2c0   :  { %v1848_v52 = vpop.f32.mrf.mxu0 }
 0x2c1   :  { %v1700_v63 = vmax.f32 %v1649_v50, 0.0  ;;  %v1849_v62 = vadd.f32 %v4155_v57, %v1848_v52  ;;  %v1484_v50 = vadd.f32 %v1483_v35, %v1395_v10  ;;  %v1402_v35 = vadd.f32 %v4096_v3, %v3922_v40 }
 0x2c3   :  { %v1938_v47 = vmax.f32 %v1849_v62, 0.0  ;;  %2548 = vmatmul.msk.f32.gmra.mxu0 %vm1725_vm2, %v1700_v63 }
 0x2c4   :  { %v1562_v37 = vpop.f32.mrf.mxu2 }
 0x2c5   :  { %v1651_v6 = vpop.f32.mrf.mxu3  ;;  %v1563_v48 = vadd.f32 %v1562_v37, %v1474_v54  ;;  %2564 = vmatmul.msk.f32.gmra.mxu1 %vm1973_vm3, %v1938_v47  ;;  %v1488_v54 = vpop.f32.mrf.mxu1  ;;  %v1397_v37 = vadd.f32 %v4066_v7, %v3899_v14 }
 0x2c7   :  { %v1652_v60 = vadd.f32 %v1651_v6, %v1563_v48  ;;  %v1486_v41 = vadd.f32 %v1485_v28, %v1397_v37 }
 0x2c8   :  { %v1851_v1 = vpop.f32.mrf.mxu0 }
 0x2c9   :  { %v1701_v43 = vmax.f32 %v1652_v60, 0.0  ;;  %v1852_v26 = vadd.f32 %v4155_v57, %v1851_v1 }
 0x2cb   :  { %v1939_v2 = vmax.f32 %v1852_v26, 0.0  ;;  %2549 = vmatmul.msk.f32.gmra.mxu0 %vm1725_vm2, %v1701_v43  ;;  %v1400_v26 = vadd.f32 %v4087_v56, %v3905_v58 }
 0x2cc   :  { %v1564_v12 = vpop.f32.mrf.mxu2 }
 0x2cd   :  { %v1653_v23 = vpop.f32.mrf.mxu3  ;;  %v1565_v51 = vadd.f32 %v1564_v12, %v1476_v20  ;;  %2565 = vmatmul.msk.f32.gmra.mxu1 %vm1973_vm3, %v1939_v2  ;;  %v1490_v20 = vpop.f32.mrf.mxu1 }
 0x2cf   :  { %v1654_v19 = vadd.f32 %v1653_v23, %v1565_v51  ;;  %v1489_v23 = vadd.f32 %v1488_v54, %v1400_v26 }
 0x2d0   :  { %v1854_v16 = vpop.f32.mrf.mxu0 }
 0x2d1   :  { %v1702_v53 = vmax.f32 %v1654_v19, 0.0  ;;  %v1855_v15 = vadd.f32 %v4155_v57, %v1854_v16 }
 0x2d3   :  { %v1940_v29 = vmax.f32 %v1855_v15, 0.0  ;;  %2550 = vmatmul.msk.f32.gmra.mxu0 %vm1725_vm2, %v1702_v53 }
 0x2d4   :  { %v1567_v21 = vpop.f32.mrf.mxu2 }
 0x2d5   :  { %v1656_v27 = vpop.f32.mrf.mxu3  ;;  %v1568_v11 = vadd.f32 %v1567_v21, %v1479_v49  ;;  %2566 = vmatmul.msk.f32.gmra.mxu1 %vm1973_vm3, %v1940_v29  ;;  %v1493_v56 = vpop.f32.mrf.mxu1  ;;  %v1491_v29 = vadd.f32 %v1490_v20, %v1402_v35  ;;  %v4240_v35 = vld [vmem:[%s4313_s6] ss:$0 sm:$0xff]  ;;  %s2798_s6 = smov [#allocation2]  }
 0x2d6   :  { %s2251_s10 = sshll.u32 %s2798_s6, 4  ;;  %s2252_s10 = int_to_ptr.vmem [resolvable:$true] %s2251_s10 }
 0x2d7   :  { %v1657_v18 = vadd.f32 %v1656_v27, %v1568_v11 }
 0x2d8   :  { %v1857_v30 = vpop.f32.mrf.mxu0 }
 0x2d9   :  { %v1703_v39 = vmax.f32 %v1657_v18, 0.0  ;;  %v1858_v34 = vadd.f32 %v4155_v57, %v1857_v30  ;;  %v1405_v18 = vadd.f32 %v4114_v8, %v3926_v25 }
 0x2db   :  { %v1941_v17 = vmax.f32 %v1858_v34, 0.0  ;;  %2551 = vmatmul.msk.f32.gmra.mxu0 %vm1725_vm2, %v1703_v39  ;;  %v1494_v34 = vadd.f32 %v1493_v56, %v1405_v18 }
 0x2dc   :  { %v1569_v33 = vpop.f32.mrf.mxu2 }
 0x2dd   :  { %v1658_v42 = vpop.f32.mrf.mxu3  ;;  %v1570_v9 = vadd.f32 %v1569_v33, %v1481_v55  ;;  %2567 = vmatmul.msk.f32.gmra.mxu1 %vm1973_vm3, %v1941_v17  ;;  %v1495_v55 = vpop.f32.mrf.mxu1 }
 0x2df   :  { %v1659_v46 = vadd.f32 %v1658_v42, %v1570_v9  ;;  %v1407_v9 = vadd.f32 %v4134_v32, %v3943_v22 }
 0x2e0   :  { %v1860_v45 = vpop.f32.mrf.mxu0 }
 0x2e1   :  { %v1704_v4 = vmax.f32 %v1659_v46, 0.0  ;;  %v1861_v5 = vadd.f32 %v4155_v57, %v1860_v45  ;;  %v1496_v45 = vadd.f32 %v1495_v55, %v1407_v9 }
 0x2e3   :  { %v1942_v52 = vmax.f32 %v1861_v5, 0.0  ;;  %2552 = vmatmul.msk.f32.gmra.mxu0 %vm1725_vm2, %v1704_v4 }
 0x2e4   :  { %v1572_v63 = vpop.f32.mrf.mxu2 }
 0x2e5   :  { %v1661_v62 = vpop.f32.mrf.mxu3  ;;  %v1573_v47 = vadd.f32 %v1572_v63, %v1484_v50  ;;  %2568 = vmatmul.msk.f32.gmra.mxu1 %vm1973_vm3, %v1942_v52  ;;  %v1498_v63 = vpop.f32.mrf.mxu1 }
 0x2e7   :  { %v1662_v6 = vadd.f32 %v1661_v62, %v1573_v47  ;;  %v1410_v62 = vadd.f32 %v4142_v61, %v3952_v13 }
 0x2e8   :  { %v1863_v0 = vpop.f32.mrf.mxu0 }
 0x2e9   :  { %v1705_v59 = vmax.f32 %v1662_v6, 0.0  ;;  %v1864_v48 = vadd.f32 %v4155_v57, %v1863_v0  ;;  %v1499_v37 = vadd.f32 %v1498_v63, %v1410_v62 }
 0x2eb   :  { %v1943_v31 = vmax.f32 %v1864_v48, 0.0  ;;  %2553 = vmatmul.msk.f32.gmra.mxu0 %vm1725_vm2, %v1705_v59 }
 0x2ec   :  { %v1574_v60 = vpop.f32.mrf.mxu2 }
 0x2ed   :  { %v1663_v1 = vpop.f32.mrf.mxu3  ;;  %v1575_v43 = vadd.f32 %v1574_v60, %v1486_v41  ;;  %2569 = vmatmul.msk.f32.gmra.mxu1 %vm1973_vm3, %v1943_v31  ;;  %v1412_v41 = vadd.f32 %v4149_v38, %v3969_v44  ;;  %v1500_v60 = vpop.f32.mrf.mxu1 }
 0x2ef   :  { %v1664_v2 = vadd.f32 %v1663_v1, %v1575_v43  ;;  %v1501_v43 = vadd.f32 %v1500_v60, %v1412_v41 }
 0x2f0   :  { %v1866_v14 = vpop.f32.mrf.mxu0 }
 0x2f1   :  { %v1706_v7 = vmax.f32 %v1664_v2, 0.0  ;;  %v1867_v12 = vadd.f32 %v4155_v57, %v1866_v14 }
 0x2f3   :  { %v1944_v51 = vmax.f32 %v1867_v12, 0.0  ;;  %2554 = vmatmul.msk.f32.gmra.mxu0 %vm1725_vm2, %v1706_v7 }
 0x2f4   :  { %v1577_v36 = vpop.f32.mrf.mxu2 }
 0x2f5   :  { %v1666_v19 = vpop.f32.mrf.mxu3  ;;  %v1578_v16 = vadd.f32 %v1577_v36, %v1489_v23  ;;  %2570 = vmatmul.msk.f32.gmra.mxu1 %vm1973_vm3, %v1944_v51 }
 0x2f7   :  { %v1667_v53 = vadd.f32 %v1666_v19, %v1578_v16 }
 0x2f8   :  { %v1869_v58 = vpop.f32.mrf.mxu0 }
 0x2f9   :  { %v1707_v15 = vmax.f32 %v1667_v53, 0.0  ;;  %v1870_v49 = vadd.f32 %v4155_v57, %v1869_v58 }
 0x2fb   :  { %v1945_v21 = vmax.f32 %v1870_v49, 0.0  ;;  %2555 = vmatmul.msk.f32.gmra.mxu0 %vm1725_vm2, %v1707_v15 }
 0x2fc   :  { %v1579_v27 = vpop.f32.mrf.mxu2 }
 0x2fd   :  { %v1668_v11 = vpop.f32.mrf.mxu3  ;;  %v1580_v24 = vadd.f32 %v1579_v27, %v1491_v29  ;;  %2571 = vmatmul.msk.f32.gmra.mxu1 %vm1973_vm3, %v1945_v21 }
 0x2ff   :  { %v1669_v30 = vadd.f32 %v1668_v11, %v1580_v24 }
 0x300   :  { %v1872_v40 = vpop.f32.mrf.mxu0 }
 0x301   :  { %v1708_v3 = vmax.f32 %v1669_v30, 0.0  ;;  %v1873_v39 = vadd.f32 %v4155_v57, %v1872_v40 }
 0x303   :  { %v1946_v28 = vmax.f32 %v1873_v39, 0.0  ;;  %2556 = vmatmul.msk.f32.gmra.mxu0 %vm1725_vm2, %v1708_v3 }
 0x304   :  { %v1582_v17 = vpop.f32.mrf.mxu2 }
 0x305   :  { %v1671_v33 = vpop.f32.mrf.mxu3  ;;  %v1583_v42 = vadd.f32 %v1582_v17, %v1494_v34  ;;  %2572 = vmatmul.msk.f32.gmra.mxu1 %vm1973_vm3, %v1946_v28 }
 0x307   :  { %v1672_v10 = vadd.f32 %v1671_v33, %v1583_v42 }
 0x308   :  { %v1875_v25 = vpop.f32.mrf.mxu0 }
 0x309   :  { %v1709_v8 = vmax.f32 %v1672_v10, 0.0  ;;  %v1876_v46 = vadd.f32 %v4155_v57, %v1875_v25 }
 0x30b   :  { %v1947_v4 = vmax.f32 %v1876_v46, 0.0  ;;  %2557 = vmatmul.msk.f32.gmra.mxu0 %vm1725_vm2, %v1709_v8 }
 0x30c   :  { %v1584_v5 = vpop.f32.mrf.mxu2 }
 0x30d   :  { %v1673_v50 = vpop.f32.mrf.mxu3  ;;  %v1585_v52 = vadd.f32 %v1584_v5, %v1496_v45  ;;  %2573 = vmatmul.msk.f32.gmra.mxu1 %vm1973_vm3, %v1947_v4 }
 0x30f   :  { %v1674_v54 = vadd.f32 %v1673_v50, %v1585_v52 }
 0x310   :  { %v1878_v22 = vpop.f32.mrf.mxu0 }
 0x311   :  { %v1710_v32 = vmax.f32 %v1674_v54, 0.0  ;;  %v1879_v47 = vadd.f32 %v4155_v57, %v1878_v22 }
 0x313   :  { %v1948_v6 = vmax.f32 %v1879_v47, 0.0  ;;  %2558 = vmatmul.msk.f32.gmra.mxu0 %vm1725_vm2, %v1710_v32 }
 0x314   :  { %v1587_v0 = vpop.f32.mrf.mxu2 }
 0x315   :  { %v1676_v59 = vpop.f32.mrf.mxu3  ;;  %v1588_v48 = vadd.f32 %v1587_v0, %v1499_v37  ;;  %2574 = vmatmul.msk.f32.gmra.mxu1 %vm1973_vm3, %v1948_v6 }
 0x317   :  { %v1677_v31 = vadd.f32 %v1676_v59, %v1588_v48 }
 0x318   :  { %v1881_v13 = vpop.f32.mrf.mxu0 }
 0x319   :  { %v1711_v61 = vmax.f32 %v1677_v31, 0.0  ;;  %v1882_v1 = vadd.f32 %v4155_v57, %v1881_v13 }
 0x31b   :  { %v1949_v26 = vmax.f32 %v1882_v1, 0.0  ;;  %2559 = vmatmul.msk.f32.gmra.mxu0 %vm1725_vm2, %v1711_v61 }
 0x31c   :  { %v1589_v20 = vpop.f32.mrf.mxu2 }
 0x31d   :  { %v1590_v2 = vadd.f32 %v1589_v20, %v1501_v43  ;;  %2575 = vmatmul.msk.f32.gmra.mxu1 %vm1973_vm3, %v1949_v26  ;;  %v1678_v14 = vpop.f32.mrf.mxu3 }
 0x31f   :  { %v1679_v7 = vadd.f32 %v1678_v14, %v1590_v2 }
 0x320   :  { %v1884_v12 = vpop.f32.mrf.mxu0 }
 0x321   :  { %v1712_v23 = vmax.f32 %v1679_v7, 0.0  ;;  %v1885_v44 = vadd.f32 %v4155_v57, %v1884_v12 }
 0x323   :  { %v1950_v38 = vmax.f32 %v1885_v44, 0.0  ;;  %2560 = vmatmul.msk.f32.gmra.mxu0 %vm1725_vm2, %v1712_v23 }
 0x325   :  { %2576 = vmatmul.msk.f32.gmra.mxu1 %vm1973_vm3, %v1950_v38 }
 0x328   :  { %v1887_v51 = vpop.f32.mrf.mxu0 }
 0x329   :  { %v1888_v36 = vadd.f32 %v4155_v57, %v1887_v51 }
 0x32a   :  { %v2087_v19 = vpop.f32.mrf.mxu1 }
 0x32b   :  { %v1951_v16 = vmax.f32 %v1888_v36, 0.0  ;;  %v2088_v15 = vadd.f32 %v4240_v35, %v2087_v19 }
 0x32d   :  { %2577 = vmatmul.msk.f32.gmra.mxu1 %vm1973_vm3, %v1951_v16 }
 0x330   :  { %v1890_v53 = vpop.f32.mrf.mxu0 }
 0x331   :  { %v1891_v58 = vadd.f32 %v4155_v57, %v1890_v53 }
 0x332   :  { %v2090_v56 = vpop.f32.mrf.mxu1 }
 0x333   :  { %v1952_v49 = vmax.f32 %v1891_v58, 0.0  ;;  %v2091_v29 = vadd.f32 %v4240_v35, %v2090_v56 }
 0x335   :  { %v2658_v21 = vpack.c.bf16 %v2091_v29, %v2088_v15  ;;  %2578 = vmatmul.msk.f32.gmra.mxu1 %vm1973_vm3, %v1952_v49 }
 0x337   :  { %2659 = vst [vmem:[#allocation2] sm:$0xff] %v2658_v21  }
 0x338   :  { %v1893_v27 = vpop.f32.mrf.mxu0 }
 0x339   :  { %v1894_v11 = vadd.f32 %v4155_v57, %v1893_v27 }
 0x33a   :  { %v2093_v24 = vpop.f32.mrf.mxu1 }
 0x33b   :  { %v1953_v18 = vmax.f32 %v1894_v11, 0.0  ;;  %v2094_v39 = vadd.f32 %v4240_v35, %v2093_v24 }
 0x33d   :  { %2579 = vmatmul.msk.f32.gmra.mxu1 %vm1973_vm3, %v1953_v18 }
 0x340   :  { %v1896_v30 = vpop.f32.mrf.mxu0 }
 0x341   :  { %v1897_v40 = vadd.f32 %v4155_v57, %v1896_v30 }
 0x342   :  { %v2096_v3 = vpop.f32.mrf.mxu1 }
 0x343   :  { %v1954_v34 = vmax.f32 %v1897_v40, 0.0  ;;  %v2097_v55 = vadd.f32 %v4240_v35, %v2096_v3 }
 0x345   :  { %v2663_v28 = vpack.c.bf16 %v2097_v55, %v2094_v39  ;;  %2580 = vmatmul.msk.f32.gmra.mxu1 %vm1973_vm3, %v1954_v34 }
 0x347   :  { %2735 = vst [vmem:[#allocation2 + $0x8] sm:$0xff] %v2663_v28  }
 0x348   :  { %v1899_v17 = vpop.f32.mrf.mxu0 }
 0x349   :  { %v1900_v33 = vadd.f32 %v4155_v57, %v1899_v17 }
 0x34a   :  { %v2099_v42 = vpop.f32.mrf.mxu1 }
 0x34b   :  { %v1955_v9 = vmax.f32 %v1900_v33, 0.0  ;;  %v2100_v46 = vadd.f32 %v4240_v35, %v2099_v42 }
 0x34d   :  { %2581 = vmatmul.msk.f32.gmra.mxu1 %vm1973_vm3, %v1955_v9 }
 0x350   :  { %v1902_v10 = vpop.f32.mrf.mxu0 }
 0x351   :  { %v1903_v25 = vadd.f32 %v4155_v57, %v1902_v10 }
 0x352   :  { %v2102_v8 = vpop.f32.mrf.mxu1 }
 0x353   :  { %v1956_v45 = vmax.f32 %v1903_v25, 0.0  ;;  %v2103_v4 = vadd.f32 %v4240_v35, %v2102_v8 }
 0x355   :  { %v2668_v5 = vpack.c.bf16 %v2103_v4, %v2100_v46  ;;  %2582 = vmatmul.msk.f32.gmra.mxu1 %vm1973_vm3, %v1956_v45 }
 0x357   :  { %2736 = vst [vmem:[#allocation2 + $0x10] sm:$0xff] %v2668_v5  }
 0x358   :  { %v1905_v50 = vpop.f32.mrf.mxu0 }
 0x359   :  { %v1906_v52 = vadd.f32 %v4155_v57, %v1905_v50 }
 0x35a   :  { %v2105_v63 = vpop.f32.mrf.mxu1 }
 0x35b   :  { %v1957_v62 = vmax.f32 %v1906_v52, 0.0  ;;  %v2106_v47 = vadd.f32 %v4240_v35, %v2105_v63 }
 0x35d   :  { %2583 = vmatmul.msk.f32.gmra.mxu1 %vm1973_vm3, %v1957_v62 }
 0x360   :  { %v1908_v54 = vpop.f32.mrf.mxu0 }
 0x361   :  { %v1909_v22 = vadd.f32 %v4155_v57, %v1908_v54 }
 0x362   :  { %v2108_v32 = vpop.f32.mrf.mxu1 }
 0x363   :  { %v1958_v37 = vmax.f32 %v1909_v22, 0.0  ;;  %v2109_v6 = vadd.f32 %v4240_v35, %v2108_v32 }
 0x365   :  { %v2673_v0 = vpack.c.bf16 %v2109_v6, %v2106_v47  ;;  %2584 = vmatmul.msk.f32.gmra.mxu1 %vm1973_vm3, %v1958_v37 }
 0x367   :  { %2737 = vst [vmem:[#allocation2 + $0x18] sm:$0xff] %v2673_v0  }
 0x368   :  { %v1911_v59 = vpop.f32.mrf.mxu0 }
 0x369   :  { %v1912_v48 = vadd.f32 %v4155_v57, %v1911_v59 }
 0x36a   :  { %v2111_v41 = vpop.f32.mrf.mxu1 }
 0x36b   :  { %v1959_v31 = vmax.f32 %v1912_v48, 0.0  ;;  %v2112_v1 = vadd.f32 %v4240_v35, %v2111_v41 }
 0x36d   :  { %2585 = vmatmul.msk.f32.gmra.mxu1 %vm1973_vm3, %v1959_v31 }
 0x370   :  { %v1914_v60 = vpop.f32.mrf.mxu0 }
 0x371   :  { %v1915_v13 = vadd.f32 %v4155_v57, %v1914_v60 }
 0x372   :  { %v2114_v61 = vpop.f32.mrf.mxu1 }
 0x373   :  { %v1960_v43 = vmax.f32 %v1915_v13, 0.0  ;;  %v2115_v26 = vadd.f32 %v4240_v35, %v2114_v61 }
 0x375   :  { %v2678_v20 = vpack.c.bf16 %v2115_v26, %v2112_v1  ;;  %2586 = vmatmul.msk.f32.gmra.mxu1 %vm1973_vm3, %v1960_v43 }
 0x377   :  { %2738 = vst [vmem:[#allocation2 + $0x20] sm:$0xff] %v2678_v20  }
 0x378   :  { %v1917_v2 = vpop.f32.mrf.mxu0 }
 0x379   :  { %v1918_v14 = vadd.f32 %v4155_v57, %v1917_v2 }
 0x37a   :  { %v2117_v7 = vpop.f32.mrf.mxu1 }
 0x37b   :  { %v1961_v12 = vmax.f32 %v1918_v14, 0.0  ;;  %v2118_v51 = vadd.f32 %v4240_v35, %v2117_v7 }
 0x37d   :  { %2587 = vmatmul.msk.f32.gmra.mxu1 %vm1973_vm3, %v1961_v12 }
 0x380   :  { %v1920_v23 = vpop.f32.mrf.mxu0 }
 0x381   :  { %v1921_v44 = vadd.f32 %v4155_v57, %v1920_v23 }
 0x382   :  { %v2120_v38 = vpop.f32.mrf.mxu1 }
 0x383   :  { %v1962_v36 = vmax.f32 %v1921_v44, 0.0  ;;  %v2121_v19 = vadd.f32 %v4240_v35, %v2120_v38 }
 0x385   :  { %v2683_v16 = vpack.c.bf16 %v2121_v19, %v2118_v51  ;;  %2588 = vmatmul.msk.f32.gmra.mxu1 %vm1973_vm3, %v1962_v36 }
 0x387   :  { %2739 = vst [vmem:[#allocation2 + $0x28] sm:$0xff] %v2683_v16  }
 0x388   :  { %v1923_v53 = vpop.f32.mrf.mxu0 }
 0x389   :  { %v1924_v58 = vadd.f32 %v4155_v57, %v1923_v53 }
 0x38a   :  { %v2123_v56 = vpop.f32.mrf.mxu1 }
 0x38b   :  { %v1963_v15 = vmax.f32 %v1924_v58, 0.0  ;;  %v2124_v27 = vadd.f32 %v4240_v35, %v2123_v56 }
 0x38d   :  { %2589 = vmatmul.msk.f32.gmra.mxu1 %vm1973_vm3, %v1963_v15 }
 0x390   :  { %v1926_v49 = vpop.f32.mrf.mxu0 }
 0x391   :  { %v1927_v29 = vadd.f32 %v4155_v57, %v1926_v49 }
 0x392   :  { %v2126_v21 = vpop.f32.mrf.mxu1 }
 0x393   :  { %v1964_v11 = vmax.f32 %v1927_v29, 0.0  ;;  %v2127_v24 = vadd.f32 %v4240_v35, %v2126_v21 }
 0x395   :  { %v2688_v18 = vpack.c.bf16 %v2127_v24, %v2124_v27  ;;  %2590 = vmatmul.msk.f32.gmra.mxu1 %vm1973_vm3, %v1964_v11 }
 0x397   :  { %2740 = vst [vmem:[#allocation2 + $0x30] sm:$0xff] %v2688_v18  }
 0x398   :  { %v1929_v30 = vpop.f32.mrf.mxu0 }
 0x399   :  { %v1930_v40 = vadd.f32 %v4155_v57, %v1929_v30 }
 0x39a   :  { %v2129_v3 = vpop.f32.mrf.mxu1 }
 0x39b   :  { %v1965_v39 = vmax.f32 %v1930_v40, 0.0  ;;  %v2130_v17 = vadd.f32 %v4240_v35, %v2129_v3 }
 0x39d   :  { %2591 = vmatmul.msk.f32.gmra.mxu1 %vm1973_vm3, %v1965_v39 }
 0x3a0   :  { %v1932_v34 = vpop.f32.mrf.mxu0 }
 0x3a1   :  { %v1933_v55 = vadd.f32 %v4155_v57, %v1932_v34 }
 0x3a2   :  { %v2132_v28 = vpop.f32.mrf.mxu1 }
 0x3a3   :  { %v1966_v33 = vmax.f32 %v1933_v55, 0.0  ;;  %v2133_v42 = vadd.f32 %v4240_v35, %v2132_v28 }
 0x3a5   :  { %v2693_v9 = vpack.c.bf16 %v2133_v42, %v2130_v17  ;;  %2592 = vmatmul.msk.f32.gmra.mxu1 %vm1973_vm3, %v1966_v33 }
 0x3a7   :  { %2741 = vst [vmem:[#allocation2 + $0x38] sm:$0xff] %v2693_v9  }
 0x3aa   :  { %v2135_v10 = vpop.f32.mrf.mxu1 }
 0x3ab   :  { %v2136_v8 = vadd.f32 %v4240_v35, %v2135_v10 }
 0x3b2   :  { %v2138_v25 = vpop.f32.mrf.mxu1 }
 0x3b3   :  { %v2139_v46 = vadd.f32 %v4240_v35, %v2138_v25 }
 0x3b5   :  { %v2698_v45 = vpack.c.bf16 %v2139_v46, %v2136_v8 }
 0x3b7   :  { %2742 = vst [vmem:[#allocation2 + $0x40] sm:$0xff] %v2698_v45  }
 0x3ba   :  { %v2141_v4 = vpop.f32.mrf.mxu1 }
 0x3bb   :  { %v2142_v5 = vadd.f32 %v4240_v35, %v2141_v4 }
 0x3c2   :  { %v2144_v57 = vpop.f32.mrf.mxu1 }
 0x3c3   :  { %v2145_v50 = vadd.f32 %v4240_v35, %v2144_v57 }
 0x3c5   :  { %v2703_v52 = vpack.c.bf16 %v2145_v50, %v2142_v5 }
 0x3c7   :  { %2743 = vst [vmem:[#allocation2 + $0x48] sm:$0xff] %v2703_v52  }
 0x3ca   :  { %v2147_v63 = vpop.f32.mrf.mxu1 }
 0x3cb   :  { %v2148_v54 = vadd.f32 %v4240_v35, %v2147_v63 }
 0x3d2   :  { %v2150_v62 = vpop.f32.mrf.mxu1 }
 0x3d3   :  { %v2151_v22 = vadd.f32 %v4240_v35, %v2150_v62 }
 0x3d5   :  { %v2708_v32 = vpack.c.bf16 %v2151_v22, %v2148_v54 }
 0x3d7   :  { %2744 = vst [vmem:[#allocation2 + $0x50] sm:$0xff] %v2708_v32  }
 0x3da   :  { %v2153_v47 = vpop.f32.mrf.mxu1 }
 0x3db   :  { %v2154_v6 = vadd.f32 %v4240_v35, %v2153_v47 }
 0x3e2   :  { %v2156_v37 = vpop.f32.mrf.mxu1 }
 0x3e3   :  { %v2157_v0 = vadd.f32 %v4240_v35, %v2156_v37 }
 0x3e5   :  { %v2713_v59 = vpack.c.bf16 %v2157_v0, %v2154_v6 }
 0x3e7   :  { %2745 = vst [vmem:[#allocation2 + $0x58] sm:$0xff] %v2713_v59  }
 0x3ea   :  { %v2159_v48 = vpop.f32.mrf.mxu1 }
 0x3eb   :  { %v2160_v31 = vadd.f32 %v4240_v35, %v2159_v48 }
 0x3f2   :  { %v2162_v41 = vpop.f32.mrf.mxu1 }
 0x3f3   :  { %v2163_v60 = vadd.f32 %v4240_v35, %v2162_v41 }
 0x3f5   :  { %v2718_v13 = vpack.c.bf16 %v2163_v60, %v2160_v31 }
 0x3f7   :  { %2746 = vst [vmem:[#allocation2 + $0x60] sm:$0xff] %v2718_v13  }
 0x3fa   :  { %v2165_v61 = vpop.f32.mrf.mxu1 }
 0x3fb   :  { %v2166_v43 = vadd.f32 %v4240_v35, %v2165_v61 }
 0x402   :  { %v2168_v1 = vpop.f32.mrf.mxu1 }
 0x403   :  { %v2169_v26 = vadd.f32 %v4240_v35, %v2168_v1 }
 0x405   :  { %v2723_v20 = vpack.c.bf16 %v2169_v26, %v2166_v43 }
 0x407   :  { %2747 = vst [vmem:[#allocation2 + $0x68] sm:$0xff] %v2723_v20  }
 0x40a   :  { %v2171_v2 = vpop.f32.mrf.mxu1 }
 0x40b   :  { %v2172_v7 = vadd.f32 %v4240_v35, %v2171_v2 }
 0x412   :  { %v2174_v14 = vpop.f32.mrf.mxu1 }
 0x413   :  { %v2175_v12 = vadd.f32 %v4240_v35, %v2174_v14 }
 0x415   :  { %v2728_v23 = vpack.c.bf16 %v2175_v12, %v2172_v7 }
 0x417   :  { %2748 = vst [vmem:[#allocation2 + $0x70] sm:$0xff] %v2728_v23  }
 0x41a   :  { %v2177_v44 = vpop.f32.mrf.mxu1 }
 0x41b   :  { %v2178_v51 = vadd.f32 %v4240_v35, %v2177_v44 }
 0x422   :  { %v2180_v38 = vpop.f32.mrf.mxu1 }
 0x423   :  { %v2181_v36 = vadd.f32 %v4240_v35, %v2180_v38 }
 0x425   :  { %v2733_v19 = vpack.c.bf16 %v2181_v36, %v2178_v51 }
 0x427   :  { %2749 = vst [vmem:[#allocation2 + $0x78] sm:$0xff] %v2733_v19  }
 0x428   :  { %2259 = dma.vmem_to_hbm [thread:$0]  %s2252_s10, 2048, %s2254_s13, [#allocation3], %s2799_s14, %s2799_s14, %s2800_s15  }
 0x429   :  { %2796 = dma.done.wait [#allocation3], 2048  }
 0x42a   :  { %2797 = vsyncadd [#allocation3], 4294965248 }
 0x42b   :  { %2264 = vsyncpa [#allocation3], 1 }

</bundles_post_ra>
